<compile_context>
chip_gen: v7x
topology: tpu7x:2x2x1
jax: 0.10.0
libtpu: 0.0.40
codegen_flags: <defaults>
</compile_context>

<pallas_src>
import functools

import jax
import jax.numpy as jnp
from jax.experimental import pallas as pl
from jax.experimental.pallas import tpu as pltpu


# --------------------------------------------------------------------------- #
# Kernels
# --------------------------------------------------------------------------- #
def _swiglu_fused_kernel(x_ref, w12_ref, b12_ref, w3_ref, b3_ref, o_ref, acc_ref,
                         *, th, n_chunks, add_identity):
    """One token tile; all weights VMEM-resident; hidden dim chunked in-kernel.

    w12_ref columns are interleaved per chunk: [gate_c | value_c] for chunk c.
    Only a (tm, 2*th) f32 intermediate is live at a time; the W3 contraction is
    accumulated into the (tm, D) f32 VMEM scratch.
    """
    x = x_ref[...]                                    # (tm, D), input dtype
    xc = x.astype(w12_ref.dtype)                      # MXU input dtype (e.g. bf16)

    for c in range(n_chunks):                         # static unroll
        g0 = c * 2 * th
        h12 = (jnp.dot(xc, w12_ref[:, g0:g0 + 2 * th],
                       preferred_element_type=jnp.float32)
               + b12_ref[:, g0:g0 + 2 * th])          # (tm, 2*th) f32
        h1 = h12[:, :th]                              # gated branch
        h2 = h12[:, th:]                              # linear branch
        hidden = (h1 * jax.nn.sigmoid(h1)) * h2       # SiLU gate, f32
        contrib = jnp.dot(hidden.astype(w3_ref.dtype),
                          w3_ref[c * th:(c + 1) * th, :],
                          preferred_element_type=jnp.float32)  # (tm, D) f32
        if c == 0:
            acc_ref[...] = contrib
        else:
            acc_ref[...] += contrib

    out = acc_ref[...] + b3_ref[...]
    if add_identity:
        out = out + x.astype(jnp.float32)
    o_ref[...] = out.astype(o_ref.dtype)


def _swiglu_streamed_kernel(x_ref, w12_ref, b12_ref, w3_ref, b3_ref, o_ref, acc_ref,
                            *, add_identity):
    """Token tile with the hidden dim streamed along an 'arbitrary' grid axis.

    Per step only a (D, 2*th) interleaved W12 slab and a (th, D) W3 slab are
    resident; the W3 contraction accumulates into an f32 VMEM scratch.  The
    output bias + residual are applied once, in the finalize branch.
    """
    k = pl.program_id(1)
    th = w3_ref.shape[0]

    xc = x_ref[...].astype(w12_ref.dtype)
    h12 = (jnp.dot(xc, w12_ref[...], preferred_element_type=jnp.float32)
           + b12_ref[...])                             # (tm, 2*th) f32
    h1 = h12[:, :th]
    h2 = h12[:, th:]
    hidden = (h1 * jax.nn.sigmoid(h1)) * h2
    contrib = jnp.dot(hidden.astype(w3_ref.dtype), w3_ref[...],
                      preferred_element_type=jnp.float32)

    @pl.when(k == 0)
    def _():
        acc_ref[...] = contrib

    @pl.when(k != 0)
    def _():
        acc_ref[...] += contrib

    @pl.when(k == pl.num_programs(1) - 1)
    def _():
        out = acc_ref[...] + b3_ref[...]
        if add_identity:
            out = out + x_ref[...].astype(jnp.float32)
        o_ref[...] = out.astype(o_ref.dtype)


# --------------------------------------------------------------------------- #
# Helpers
# --------------------------------------------------------------------------- #
def _round_up(n, m):
    return ((n + m - 1) // m) * m


def _vmem_capacity_bytes():
    """Physical VMEM per TensorCore; conservative (v7x) fallback if unknown."""
    try:
        info = pltpu.get_tpu_info()
        cap = getattr(info, "vmem_capacity_bytes", None)
        if cap:
            return int(cap)
    except Exception:
        pass
    return 64 * 1024 * 1024


def _pad_and_tile_hidden(H):
    """Pad H to a multiple of the hidden chunk size th (>=256 when H allows,
    never 128 for H >= 256 since v6e/v7x MXUs are 256-deep)."""
    if H < 256:
        return _round_up(H, 128), 128
    H_pad = _round_up(H, 256)
    th = 512 if H_pad % 512 == 0 else 256
    return H_pad, th


def _fused_vmem_bytes(tm, D, H_pad, th, x_item, w_item, wbuf=1):
    weights = wbuf * (D * 2 * H_pad * w_item + 2 * H_pad * 4
                      + H_pad * D * w_item + D * 4)
    io = 2 * 2 * tm * D * x_item            # double-buffered x + out tiles
    acc = tm * D * 4                        # f32 accumulator scratch
    inter = 2 * tm * 2 * th * 4             # per-chunk f32 intermediates
    return weights + io + acc + inter


def _streamed_vmem_bytes(tm, D, th, x_item, w_item):
    weights = 2 * (D * 2 * th * w_item + 2 * th * 4 + th * D * w_item + D * 4)
    io = 2 * 2 * tm * D * x_item
    acc = tm * D * 4
    inter = 2 * tm * 2 * th * 4
    return weights + io + acc + inter


def _maybe_buffered_spec(shape, index_map, buffers=None):
    """BlockSpec with an optional pipeline_mode=pl.Buffered(n) hint."""
    if buffers is None:
        return pl.BlockSpec(shape, index_map)
    try:
        return pl.BlockSpec(shape, index_map, pipeline_mode=pl.Buffered(buffers))
    except TypeError:  # older jax without pipeline_mode kwarg
        return pl.BlockSpec(shape, index_map)


def _prepare_weights(params, H, H_pad, th, cdt):
    """Cast, zero-pad H -> H_pad, and interleave W12/b12 per hidden chunk so the
    kernel reads one contiguous [gate_c | value_c] slab per chunk."""
    w12, b12, w3, b3 = params["w12"], params["b12"], params["w3"], params["b3"]
    D = w12.shape[0]
    b12 = b12.reshape(1, 2 * H)

    w1 = w12[:, :H].astype(cdt)
    w2 = w12[:, H:].astype(cdt)
    b1 = b12[:, :H].astype(jnp.float32)
    b2 = b12[:, H:].astype(jnp.float32)
    pad_h = H_pad - H
    if pad_h:
        w1 = jnp.pad(w1, ((0, 0), (0, pad_h)))
        w2 = jnp.pad(w2, ((0, 0), (0, pad_h)))
        b1 = jnp.pad(b1, ((0, 0), (0, pad_h)))
        b2 = jnp.pad(b2, ((0, 0), (0, pad_h)))

    n_chunks = H_pad // th
    w12_il = jnp.stack([w1.reshape(D, n_chunks, th),
                        w2.reshape(D, n_chunks, th)], axis=2).reshape(D, 2 * H_pad)
    b12_il = jnp.stack([b1.reshape(1, n_chunks, th),
                        b2.reshape(1, n_chunks, th)], axis=2).reshape(1, 2 * H_pad)

    w3p = w3.astype(cdt)
    if pad_h:
        w3p = jnp.pad(w3p, ((0, pad_h), (0, 0)))   # padded rows are zero -> no effect
    b3f = b3.reshape(1, -1).astype(jnp.float32)
    return w12_il, b12_il, w3p, b3f


# --------------------------------------------------------------------------- #
# Wrapper
# --------------------------------------------------------------------------- #
def swiglu_ffn(x, params, *, tm=None, force_streamed=False, compute_dtype="auto",
               add_identity=True, vmem_limit_bytes=None):
    """SwiGLU FFN forward.  x: (B, N, D) -> (B, N, D).

    tm:             token tile (multiple of 128); auto: 256 (resident path) or
                    512 (streamed path), capped by T and the VMEM budget.
    force_streamed: force the H-streamed reduction path (otherwise auto-selected
                    from the generation-aware VMEM budget).
    compute_dtype:  MXU input dtype.  "auto" -> bfloat16 when x is float32
                    (native MXU dtype on v5e/v6e/v7x); None -> x.dtype.
                    SiLU / bias / residual / accumulation always stay f32.
    """
    # TODO(synk): norm_cfg / dropout_layer / gamma2 are nn.Identity in the default
    # config and are not implemented here; a separate `identity` residual tensor
    # is also not supported (the residual is x itself, as in the default call).
    w12, b12, w3, b3 = params["w12"], params["b12"], params["w3"], params["b3"]
    B, N, D = x.shape
    H = w3.shape[0]
    assert w12.shape == (D, 2 * H) and w3.shape == (H, D), "out_dims must equal embed_dims"

    if compute_dtype == "auto":
        cdt = jnp.dtype(jnp.bfloat16) if x.dtype == jnp.dtype(jnp.float32) else jnp.dtype(x.dtype)
    elif compute_dtype is None:
        cdt = jnp.dtype(x.dtype)
    else:
        cdt = jnp.dtype(compute_dtype)

    x_item = jnp.dtype(x.dtype).itemsize
    w_item = cdt.itemsize

    H_pad, th = _pad_and_tile_hidden(H)
    n_chunks = H_pad // th

    vmem_cap = _vmem_capacity_bytes()
    if vmem_limit_bytes is None:
        # v7x (64 MiB/TC): keep scoped VMEM <= ~40 MiB; 128 MiB parts: ~100 MiB.
        if vmem_cap <= (64 << 20):
            vmem_limit_bytes = 40 << 20
        else:
            vmem_limit_bytes = min(100 << 20, int(0.8 * vmem_cap))
    headroom = 4 << 20   # compiler-internal scratch

    T = B * N
    x2d = x.reshape(T, D)
    w12_il, b12_il, w3p, b3f = _prepare_weights(params, H, H_pad, th, cdt)

    # ---- Path + tile selection ------------------------------------------- #
    tm_f = 256 if tm is None else tm
    tm_f = max(128, min(_round_up(tm_f, 128), _round_up(max(T, 1), 128)))
    use_fused = (not force_streamed) and (
        _fused_vmem_bytes(tm_f, D, H_pad, th, x_item, w_item, wbuf=1) + headroom
        <= vmem_limit_bytes)

    if use_fused:
        tm_sel = tm_f
    else:
        # Streamed path re-reads all weights once per token tile -> use a big
        # token tile (>=512 where possible) to stay MXU-bound.
        tm_sel = 512 if tm is None else tm
        tm_sel = max(128, min(_round_up(tm_sel, 128), _round_up(max(T, 1), 128)))
        while tm_sel > 128 and (_streamed_vmem_bytes(tm_sel, D, th, x_item, w_item)
                                + headroom > vmem_limit_bytes):
            tm_sel //= 2
        tm_sel = max(128, tm_sel)

    T_pad = _round_up(max(T, 1), tm_sel)
    if T_pad != T:
        x2d = jnp.pad(x2d, ((0, T_pad - T), (0, 0)))
    n_t = T_pad // tm_sel

    # ---- Cost estimate ----------------------------------------------------- #
    flops = 2 * T_pad * D * 2 * H_pad + 2 * T_pad * H_pad * D + 4 * T_pad * H_pad
    weight_bytes = (D * 2 * H_pad + H_pad * D) * w_item + (2 * H_pad + D) * 4
    io_bytes = 2 * T_pad * D * x_item
    bytes_accessed = io_bytes + weight_bytes * (1 if use_fused else n_t)
    cost = pl.CostEstimate(flops=flops, transcendentals=T_pad * H_pad,
                           bytes_accessed=bytes_accessed)

    operands = (x2d, w12_il, b12_il, w3p, b3f)

    if use_fused:
        def build(single_buffer_weights):
            wb = 1 if single_buffer_weights else None
            kern = functools.partial(_swiglu_fused_kernel, th=th,
                                     n_chunks=n_chunks, add_identity=add_identity)
            return pl.pallas_call(
                kern,
                out_shape=jax.ShapeDtypeStruct((T_pad, D), x.dtype),
                grid_spec=pltpu.PrefetchScalarGridSpec(
                    num_scalar_prefetch=0,
                    grid=(n_t,),
                    in_specs=[
                        pl.BlockSpec((tm_sel, D), lambda i: (i, 0)),            # x tile
                        _maybe_buffered_spec((D, 2 * H_pad), lambda i: (0, 0), wb),  # W12 (resident)
                        _maybe_buffered_spec((1, 2 * H_pad), lambda i: (0, 0), wb),  # b12
                        _maybe_buffered_spec((H_pad, D), lambda i: (0, 0), wb),      # W3 (resident)
                        _maybe_buffered_spec((1, D), lambda i: (0, 0), wb),          # b3
                    ],
                    out_specs=pl.BlockSpec((tm_sel, D), lambda i: (i, 0)),
                    scratch_shapes=[pltpu.VMEM((tm_sel, D), jnp.float32)],       # f32 accumulator
                ),
                compiler_params=pltpu.CompilerParams(
                    dimension_semantics=("parallel",),
                    vmem_limit_bytes=vmem_limit_bytes),
                cost_estimate=cost,
            )
        try:
            out2d = build(True)(*operands)
        except Exception:
            # Conservative fallback if Buffered(1) hints are unsupported.
            out2d = build(False)(*operands)
    else:
        kern = functools.partial(_swiglu_streamed_kernel, add_identity=add_identity)
        out2d = pl.pallas_call(
            kern,
            out_shape=jax.ShapeDtypeStruct((T_pad, D), x.dtype),
            grid_spec=pltpu.PrefetchScalarGridSpec(
                num_scalar_prefetch=0,
                grid=(n_t, n_chunks),
                in_specs=[
                    pl.BlockSpec((tm_sel, D), lambda i, k: (i, 0)),      # x tile
                    pl.BlockSpec((D, 2 * th), lambda i, k: (0, k)),      # interleaved W12 slab
                    pl.BlockSpec((1, 2 * th), lambda i, k: (0, k)),      # interleaved b12 slab
                    pl.BlockSpec((th, D), lambda i, k: (k, 0)),          # W3 slab
                    pl.BlockSpec((1, D), lambda i, k: (0, 0)),           # b3
                ],
                out_specs=pl.BlockSpec((tm_sel, D), lambda i, k: (i, 0)),
                scratch_shapes=[pltpu.VMEM((tm_sel, D), jnp.float32)],   # f32 accumulator
            ),
            compiler_params=pltpu.CompilerParams(
                dimension_semantics=("parallel", "arbitrary"),
                vmem_limit_bytes=vmem_limit_bytes),
            cost_estimate=cost,
        )(*operands)

    if T_pad != T:
        out2d = out2d[:T]
    return out2d.reshape(B, N, D)


# --------------------------------------------------------------------------- #
# Params / reference
# --------------------------------------------------------------------------- #
def init_params(key, embed_dims, hidden_dims, dtype=jnp.float32):
    """Synthetic weights matching torch nn.Linear init, stored transposed (in, out)."""
    k1, k2, k3, k4 = jax.random.split(key, 4)
    D, H = embed_dims, hidden_dims
    s12 = float(D) ** -0.5
    s3 = float(H) ** -0.5
    return {
        "w12": jax.random.uniform(k1, (D, 2 * H), dtype, -s12, s12),
        "b12": jax.random.uniform(k2, (1, 2 * H), dtype, -s12, s12),
        "w3": jax.random.uniform(k3, (H, D), dtype, -s3, s3),
        "b3": jax.random.uniform(k4, (1, D), dtype, -s3, s3),
    }


def swiglu_ffn_ref(x, params, compute_dtype=None):
    """Pure-JAX reference mirroring the kernel numerics."""
    w12, b12, w3, b3 = params["w12"], params["b12"], params["w3"], params["b3"]
    H = w3.shape[0]
    if compute_dtype is not None:
        xc = x.astype(compute_dtype).astype(jnp.float32)
        w12 = w12.astype(compute_dtype).astype(jnp.float32)
        w3 = w3.astype(compute_dtype).astype(jnp.float32)
    else:
        xc = x
    h = xc @ w12 + b12.reshape(1, -1)
    h1, h2 = h[..., :H], h[..., H:]
    hidden = jax.nn.silu(h1) * h2
    if compute_dtype is not None:
        hidden = hidden.astype(compute_dtype).astype(jnp.float32)
    out = hidden @ w3 + b3.reshape(1, -1)
    return x + out.astype(x.dtype)


if __name__ == "__main__":
    key = jax.random.PRNGKey(0)
    kx, kp, kx2, kp2 = jax.random.split(key, 4)

    # --- Case 1: small SwiGLUFFN, resident fused path, f32 MXU (tight check). ---
    B, N, D, H = 2, 8, 32, 64
    x = jax.random.normal(kx, (B, N, D), jnp.float32)
    params = init_params(kp, D, H)

    out = jax.block_until_ready(swiglu_ffn(x, params, compute_dtype=jnp.float32))
    ref = swiglu_ffn_ref(x, params)
    assert out.shape == (B, N, D)
    assert jnp.allclose(out, ref, atol=1e-4, rtol=1e-4), "fused f32 mismatch"

    # --- Case 2: default path (bf16 MXU inputs, f32 accumulation). ---
    out_bf16 = jax.block_until_ready(swiglu_ffn(x, params))
    ref_bf16 = swiglu_ffn_ref(x, params, compute_dtype=jnp.bfloat16)
    assert jnp.allclose(out_bf16, ref_bf16, atol=2e-2, rtol=2e-2), "fused bf16 mismatch"

    # --- Case 3: multi-chunk hidden dim, both resident (chunked loop) and
    #     streamed (H grid axis) paths. ---
    B2, N2, D2, H2 = 2, 64, 64, 768      # H_pad=768, th=256 -> 3 hidden chunks
    x2 = jax.random.normal(kx2, (B2, N2, D2), jnp.float32)
    params2 = init_params(kp2, D2, H2)
    ref2 = swiglu_ffn_ref(x2, params2)

    out2a = jax.block_until_ready(swiglu_ffn(x2, params2, compute_dtype=jnp.float32))
    assert out2a.shape == (B2, N2, D2)
    assert jnp.allclose(out2a, ref2, atol=1e-3, rtol=1e-3), "chunked fused mismatch"

    out2b = jax.block_until_ready(
        swiglu_ffn(x2, params2, compute_dtype=jnp.float32, force_streamed=True))
    assert jnp.allclose(out2b, ref2, atol=1e-3, rtol=1e-3), "streamed H-tiled mismatch"

    print("KERNEL_OK")
</pallas_src>

<mosaic_0001>
module attributes {stable_mosaic.version = 11 : i64} {
  func.func @_swiglu_fused_kernel(%arg0: i32, %arg1: memref<128x32xf32, #tpu.memory_space<vmem>>, %arg2: memref<32x256xf32, #tpu.memory_space<vmem>>, %arg3: memref<1x256xf32, #tpu.memory_space<vmem>>, %arg4: memref<128x32xf32, #tpu.memory_space<vmem>>, %arg5: memref<1x32xf32, #tpu.memory_space<vmem>>, %arg6: memref<128x32xf32, #tpu.memory_space<vmem>>, %arg7: memref<128x32xf32, #tpu.memory_space<vmem>>) attributes {dimension_semantics = [#tpu.dimension_semantics<parallel>], iteration_bounds = array<i64: 1>, scalar_prefetch = 0 : i64, scratch_operands = 1 : i64, tpu.core_type = #tpu.core_type<tc>, window_params = [{transform_indices = @transform_0, window_bounds = array<i64: 128, 32>}, {pipeline_mode = #tpu.pipeline_mode<synchronous>, transform_indices = @transform_1, window_bounds = array<i64: 32, 256>}, {pipeline_mode = #tpu.pipeline_mode<synchronous>, transform_indices = @transform_2, window_bounds = array<i64: 1, 256>}, {pipeline_mode = #tpu.pipeline_mode<synchronous>, transform_indices = @transform_3, window_bounds = array<i64: 128, 32>}, {pipeline_mode = #tpu.pipeline_mode<synchronous>, transform_indices = @transform_4, window_bounds = array<i64: 1, 32>}, {transform_indices = @transform_5, window_bounds = array<i64: 128, 32>}]} {
    %c0 = arith.constant 0 : index
    %c0_0 = arith.constant 0 : index
    %0 = vector.load %arg1[%c0, %c0_0] : memref<128x32xf32, #tpu.memory_space<vmem>>, vector<128x32xf32>
    %c0_1 = arith.constant 0 : index
    %c0_2 = arith.constant 0 : index
    %1 = vector.load %arg2[%c0_1, %c0_2] : memref<32x256xf32, #tpu.memory_space<vmem>>, vector<32x256xf32>
    %cst = arith.constant dense<0.000000e+00> : vector<128x256xf32>
    %2 = tpu.matmul %0, %1, %cst {dimension_numbers = #tpu.dot_dimension_numbers<[1], [0], [0], [1], [0, 0, 1, 1], [], []>} : vector<128x32xf32>, vector<32x256xf32>, vector<128x256xf32> -> vector<128x256xf32>
    %c0_3 = arith.constant 0 : index
    %c0_4 = arith.constant 0 : index
    %3 = vector.load %arg3[%c0_3, %c0_4] : memref<1x256xf32, #tpu.memory_space<vmem>>, vector<1x256xf32>
    %4 = vector.broadcast %3 : vector<1x256xf32> to vector<128x256xf32>
    %5 = arith.addf %2, %4 : vector<128x256xf32>
    %6 = vector.extract_strided_slice %5 {offsets = [0, 0], sizes = [128, 128], strides = [1, 1]} : vector<128x256xf32> to vector<128x128xf32>
    %7 = vector.extract_strided_slice %5 {offsets = [0, 128], sizes = [128, 128], strides = [1, 1]} : vector<128x256xf32> to vector<128x128xf32>
    %8 = arith.negf %6 : vector<128x128xf32>
    %9 = math.exp %8 : vector<128x128xf32>
    %cst_5 = arith.constant 1.000000e+00 : f32
    %10 = vector.broadcast %cst_5 : f32 to vector<128x128xf32>
    %11 = arith.addf %10, %9 : vector<128x128xf32>
    %12 = arith.divf %10, %11 : vector<128x128xf32>
    %13 = arith.mulf %6, %12 : vector<128x128xf32>
    %14 = arith.mulf %13, %7 : vector<128x128xf32>
    %c0_6 = arith.constant 0 : index
    %c0_7 = arith.constant 0 : index
    %15 = vector.load %arg4[%c0_6, %c0_7] : memref<128x32xf32, #tpu.memory_space<vmem>>, vector<128x32xf32>
    %cst_8 = arith.constant dense<0.000000e+00> : vector<128x32xf32>
    %16 = tpu.matmul %14, %15, %cst_8 {dimension_numbers = #tpu.dot_dimension_numbers<[1], [0], [0], [1], [0, 0, 1, 1], [], []>} : vector<128x128xf32>, vector<128x32xf32>, vector<128x32xf32> -> vector<128x32xf32>
    %c0_9 = arith.constant 0 : index
    %c0_10 = arith.constant 0 : index
    %17 = vector.load %arg7[%c0_9, %c0_10] : memref<128x32xf32, #tpu.memory_space<vmem>>, vector<128x32xf32>
    tpu.vector_store %arg7[%c0_9, %c0_10], %16 {strides = array<i32>} : memref<128x32xf32, #tpu.memory_space<vmem>>, vector<128x32xf32>,
    %c0_11 = arith.constant 0 : index
    %c0_12 = arith.constant 0 : index
    %18 = vector.load %arg7[%c0_11, %c0_12] : memref<128x32xf32, #tpu.memory_space<vmem>>, vector<128x32xf32>
    %c0_13 = arith.constant 0 : index
    %c0_14 = arith.constant 0 : index
    %19 = vector.load %arg5[%c0_13, %c0_14] : memref<1x32xf32, #tpu.memory_space<vmem>>, vector<1x32xf32>
    %20 = vector.broadcast %19 : vector<1x32xf32> to vector<128x32xf32>
    %21 = arith.addf %18, %20 : vector<128x32xf32>
    %22 = arith.addf %21, %0 : vector<128x32xf32>
    %c0_15 = arith.constant 0 : index
    %c0_16 = arith.constant 0 : index
    %23 = vector.load %arg6[%c0_15, %c0_16] : memref<128x32xf32, #tpu.memory_space<vmem>>, vector<128x32xf32>
    tpu.vector_store %arg6[%c0_15, %c0_16], %22 {strides = array<i32>} : memref<128x32xf32, #tpu.memory_space<vmem>>, vector<128x32xf32>,
    return
  }
  func.func @transform_0(%arg0: i32) -> (i32, i32) {
    %c0_i32 = arith.constant 0 : i32
    %c0_i32_0 = arith.constant 0 : i32
    return %arg0, %c0_i32 : i32, i32
  }
  func.func @transform_1(%arg0: i32) -> (i32, i32) {
    %c0_i32 = arith.constant 0 : i32
    %c0_i32_0 = arith.constant 0 : i32
    %c0_i32_1 = arith.constant 0 : i32
    return %c0_i32, %c0_i32_0 : i32, i32
  }
  func.func @transform_2(%arg0: i32) -> (i32, i32) {
    %c0_i32 = arith.constant 0 : i32
    %c0_i32_0 = arith.constant 0 : i32
    %c0_i32_1 = arith.constant 0 : i32
    return %c0_i32, %c0_i32_0 : i32, i32
  }
  func.func @transform_3(%arg0: i32) -> (i32, i32) {
    %c0_i32 = arith.constant 0 : i32
    %c0_i32_0 = arith.constant 0 : i32
    %c0_i32_1 = arith.constant 0 : i32
    return %c0_i32, %c0_i32_0 : i32, i32
  }
  func.func @transform_4(%arg0: i32) -> (i32, i32) {
    %c0_i32 = arith.constant 0 : i32
    %c0_i32_0 = arith.constant 0 : i32
    %c0_i32_1 = arith.constant 0 : i32
    return %c0_i32, %c0_i32_0 : i32, i32
  }
  func.func @transform_5(%arg0: i32) -> (i32, i32) {
    %c0_i32 = arith.constant 0 : i32
    %c0_i32_0 = arith.constant 0 : i32
    return %arg0, %c0_i32 : i32, i32
  }
}

module attributes {stable_mosaic.version = 11 : i64} {
  func.func @_swiglu_fused_kernel(%arg0: i32, %arg1: memref<128x32xf32, #tpu.memory_space<vmem>>, %arg2: memref<32x256xf32, #tpu.memory_space<vmem>>, %arg3: memref<1x256xf32, #tpu.memory_space<vmem>>, %arg4: memref<128x32xf32, #tpu.memory_space<vmem>>, %arg5: memref<1x32xf32, #tpu.memory_space<vmem>>, %arg6: memref<128x32xf32, #tpu.memory_space<vmem>>, %arg7: memref<128x32xf32, #tpu.memory_space<vmem>>) attributes {dimension_semantics = [#tpu.dimension_semantics<parallel>], iteration_bounds = array<i64: 1>, scalar_prefetch = 0 : i64, scratch_operands = 1 : i64, tpu.core_type = #tpu.core_type<tc>, window_params = [{transform_indices = @transform_0, window_bounds = array<i64: 128, 32>}, {pipeline_mode = #tpu.pipeline_mode<synchronous>, transform_indices = @transform_1, window_bounds = array<i64: 32, 256>}, {pipeline_mode = #tpu.pipeline_mode<synchronous>, transform_indices = @transform_2, window_bounds = array<i64: 1, 256>}, {pipeline_mode = #tpu.pipeline_mode<synchronous>, transform_indices = @transform_3, window_bounds = array<i64: 128, 32>}, {pipeline_mode = #tpu.pipeline_mode<synchronous>, transform_indices = @transform_4, window_bounds = array<i64: 1, 32>}, {transform_indices = @transform_5, window_bounds = array<i64: 128, 32>}]} {
    %c0 = arith.constant 0 : index
    %c0_0 = arith.constant 0 : index
    %0 = vector.load %arg1[%c0, %c0_0] : memref<128x32xf32, #tpu.memory_space<vmem>>, vector<128x32xf32>
    %c0_1 = arith.constant 0 : index
    %c0_2 = arith.constant 0 : index
    %1 = vector.load %arg2[%c0_1, %c0_2] : memref<32x256xf32, #tpu.memory_space<vmem>>, vector<32x256xf32>
    %cst = arith.constant dense<0.000000e+00> : vector<128x256xf32>
    %2 = tpu.matmul %0, %1, %cst {dimension_numbers = #tpu.dot_dimension_numbers<[1], [0], [0], [1], [0, 0, 1, 1], [], []>} : vector<128x32xf32>, vector<32x256xf32>, vector<128x256xf32> -> vector<128x256xf32>
    %c0_3 = arith.constant 0 : index
    %c0_4 = arith.constant 0 : index
    %3 = vector.load %arg3[%c0_3, %c0_4] : memref<1x256xf32, #tpu.memory_space<vmem>>, vector<1x256xf32>
    %4 = vector.broadcast %3 : vector<1x256xf32> to vector<128x256xf32>
    %5 = arith.addf %2, %4 : vector<128x256xf32>
    %6 = vector.extract_strided_slice %5 {offsets = [0, 0], sizes = [128, 128], strides = [1, 1]} : vector<128x256xf32> to vector<128x128xf32>
    %7 = vector.extract_strided_slice %5 {offsets = [0, 128], sizes = [128, 128], strides = [1, 1]} : vector<128x256xf32> to vector<128x128xf32>
    %8 = arith.negf %6 : vector<128x128xf32>
    %9 = math.exp %8 : vector<128x128xf32>
    %cst_5 = arith.constant 1.000000e+00 : f32
    %10 = vector.broadcast %cst_5 : f32 to vector<128x128xf32>
    %11 = arith.addf %10, %9 : vector<128x128xf32>
    %12 = arith.divf %10, %11 : vector<128x128xf32>
    %13 = arith.mulf %6, %12 : vector<128x128xf32>
    %14 = arith.mulf %13, %7 : vector<128x128xf32>
    %c0_6 = arith.constant 0 : index
    %c0_7 = arith.constant 0 : index
    %15 = vector.load %arg4[%c0_6, %c0_7] : memref<128x32xf32, #tpu.memory_space<vmem>>, vector<128x32xf32>
    %cst_8 = arith.constant dense<0.000000e+00> : vector<128x32xf32>
    %16 = tpu.matmul %14, %15, %cst_8 {dimension_numbers = #tpu.dot_dimension_numbers<[1], [0], [0], [1], [0, 0, 1, 1], [], []>} : vector<128x128xf32>, vector<128x32xf32>, vector<128x32xf32> -> vector<128x32xf32>
    %c0_9 = arith.constant 0 : index
    %c0_10 = arith.constant 0 : index
    %17 = vector.load %arg7[%c0_9, %c0_10] : memref<128x32xf32, #tpu.memory_space<vmem>>, vector<128x32xf32>
    tpu.vector_store %arg7[%c0_9, %c0_10], %16 {strides = array<i32>} : memref<128x32xf32, #tpu.memory_space<vmem>>, vector<128x32xf32>,
    %c0_11 = arith.constant 0 : index
    %c0_12 = arith.constant 0 : index
    %18 = vector.load %arg7[%c0_11, %c0_12] : memref<128x32xf32, #tpu.memory_space<vmem>>, vector<128x32xf32>
    %c0_13 = arith.constant 0 : index
    %c0_14 = arith.constant 0 : index
    %19 = vector.load %arg5[%c0_13, %c0_14] : memref<1x32xf32, #tpu.memory_space<vmem>>, vector<1x32xf32>
    %20 = vector.broadcast %19 : vector<1x32xf32> to vector<128x32xf32>
    %21 = arith.addf %18, %20 : vector<128x32xf32>
    %22 = arith.addf %21, %0 : vector<128x32xf32>
    %c0_15 = arith.constant 0 : index
    %c0_16 = arith.constant 0 : index
    %23 = vector.load %arg6[%c0_15, %c0_16] : memref<128x32xf32, #tpu.memory_space<vmem>>, vector<128x32xf32>
    tpu.vector_store %arg6[%c0_15, %c0_16], %22 {strides = array<i32>} : memref<128x32xf32, #tpu.memory_space<vmem>>, vector<128x32xf32>,
    return
  }
  func.func @transform_0(%arg0: i32) -> (i32, i32) {
    %c0_i32 = arith.constant 0 : i32
    %c0_i32_0 = arith.constant 0 : i32
    return %arg0, %c0_i32 : i32, i32
  }
  func.func @transform_1(%arg0: i32) -> (i32, i32) {
    %c0_i32 = arith.constant 0 : i32
    %c0_i32_0 = arith.constant 0 : i32
    %c0_i32_1 = arith.constant 0 : i32
    return %c0_i32, %c0_i32_0 : i32, i32
  }
  func.func @transform_2(%arg0: i32) -> (i32, i32) {
    %c0_i32 = arith.constant 0 : i32
    %c0_i32_0 = arith.constant 0 : i32
    %c0_i32_1 = arith.constant 0 : i32
    return %c0_i32, %c0_i32_0 : i32, i32
  }
  func.func @transform_3(%arg0: i32) -> (i32, i32) {
    %c0_i32 = arith.constant 0 : i32
    %c0_i32_0 = arith.constant 0 : i32
    %c0_i32_1 = arith.constant 0 : i32
    return %c0_i32, %c0_i32_0 : i32, i32
  }
  func.func @transform_4(%arg0: i32) -> (i32, i32) {
    %c0_i32 = arith.constant 0 : i32
    %c0_i32_0 = arith.constant 0 : i32
    %c0_i32_1 = arith.constant 0 : i32
    return %c0_i32, %c0_i32_0 : i32, i32
  }
  func.func @transform_5(%arg0: i32) -> (i32, i32) {
    %c0_i32 = arith.constant 0 : i32
    %c0_i32_0 = arith.constant 0 : i32
    return %arg0, %c0_i32 : i32, i32
  }
}

</mosaic_0001>

<bundles_post_ra>
// kernel: tpu_custom_call.1
= control target key start
LH: loop header
LB: loop body
LE: loop exit
PB: predicated region body
PF: predicated region fallthrough
CT: control target
= control target key end

     0   :  { %v872_v3 = vmov 0.0   ;;  %vm56_vm0 = vcmask 261120   ;;  %v46_v53 = vlaneseq  ;;  %s1327_s1 = inlined_call_operand.vmem [shape: f32[32,256], index: 1, kind: input, shape index: {}]   ;;  %s1328_s0 = inlined_call_operand.vmem [shape: f32[128,32], index: 0, kind: input, shape index: {}]   ;;  %s1329_s3 = inlined_call_operand.vmem [shape: f32[128,32], index: 3, kind: input, shape index: {}]   ;;  %s1330_s2 = inlined_call_operand.vmem [shape: f32[1,256], index: 2, kind: input, shape index: {}]   ;;  %s1331_s4 = inlined_call_operand.vmem [shape: f32[1,32], index: 4, kind: input, shape index: {}]   ;;  %s1332_s5 = inlined_call_operand.vmem [shape: f32[128,32], index: 5, kind: output, shape index: {}]  }
   0x1   :  { %v37_v0 = vld [vmem:[%s1327_s1 + $0x8] sm:$0xff]  ;;  %v39_v1 = vld [vmem:[%s1327_s1 + $0x18] sm:$0xff]  ;;  %v36_v2 = vld [vmem:[%s1327_s1] sm:$0xff]  ;;  %169 = vmatprep.mubr.f32.mxu0 %v872_v3 }
   0x2   :  { %v767_v4 = vpack.c.bf16 %v39_v1, %v37_v0  ;;  %v38_v5 = vld [vmem:[%s1327_s1 + $0x10] sm:$0xff]  ;;  %v41_v6 = vld [vmem:[%s1327_s1 + $0x28] sm:$0xff]  ;;  %v43_v7 = vld [vmem:[%s1327_s1 + $0x38] sm:$0xff]  ;;  %v47_v54 = vshrl.u32 %v46_v53, 7 }
   0x3   :  { %v769_v8 = vpack.c.bf16 %v38_v5, %v36_v2  ;;  %v771_v9 = vpack.c.bf16 %v43_v7, %v41_v6  ;;  %v40_v10 = vld [vmem:[%s1327_s1 + $0x20] sm:$0xff]  ;;  %v42_v11 = vld [vmem:[%s1327_s1 + $0x30] sm:$0xff]  ;;  %v937_v14 = vld [vmem:[%s1328_s0 + $0x8] sm:$0xff] }
   0x4   :  { %768 = vmatprep.subr.bf16.mxu0 %v767_v4  ;;  %v773_v12 = vpack.c.bf16 %v42_v11, %v40_v10  ;;  %v930_v13 = vld [vmem:[%s1328_s0] sm:$0xff]  ;;  %v944_v15 = vld [vmem:[%s1328_s0 + $0x10] sm:$0xff]  ;;  %v951_v16 = vld [vmem:[%s1328_s0 + $0x18] sm:$0xff]  ;;  %v48_v55 = vsub.s32 0, %v47_v54 }
   0x5   :  { %770 = vmatpush1.bf16.msra.mxu0 %v769_v8  ;;  %v958_v17 = vld [vmem:[%s1328_s0 + $0x20] sm:$0xff]  ;;  %v965_v18 = vld [vmem:[%s1328_s0 + $0x28] sm:$0xff]  ;;  %v972_v19 = vld [vmem:[%s1328_s0 + $0x30] sm:$0xff] }
   0x6   :  { %772 = vmatprep.subr.bf16.mxu0 %v771_v9  ;;  %v979_v20 = vld [vmem:[%s1328_s0 + $0x38] sm:$0xff]  ;;  %v986_v21 = vld [vmem:[%s1328_s0 + $0x40] sm:$0xff]  ;;  %v993_v22 = vld [vmem:[%s1328_s0 + $0x48] sm:$0xff] }
   0x7   :  { %v1000_v23 = vld [vmem:[%s1328_s0 + $0x50] sm:$0xff]  ;;  %v1007_v24 = vld [vmem:[%s1328_s0 + $0x58] sm:$0xff]  ;;  %v1014_v25 = vld [vmem:[%s1328_s0 + $0x60] sm:$0xff] }
   0x8   :  { %v1021_v26 = vld [vmem:[%s1328_s0 + $0x68] sm:$0xff]  ;;  %v1028_v27 = vld [vmem:[%s1328_s0 + $0x70] sm:$0xff]  ;;  %v1035_v28 = vld [vmem:[%s1328_s0 + $0x78] sm:$0xff] }
   0x9   :  { %774 = vmatpush1.bf16.msra.mxu0 %v773_v12  ;;  %v394_v29 = vld [vmem:[%s1329_s3] sm:$0xff]  ;;  %v395_v30 = vld [vmem:[%s1329_s3 + $0x8] sm:$0xff]  ;;  %v396_v32 = vld [vmem:[%s1329_s3 + $0x10] sm:$0xff] }
   0xa   :  { %v775_v31 = vpack.c.bf16 %v395_v30, %v394_v29  ;;  %v397_v33 = vld [vmem:[%s1329_s3 + $0x18] sm:$0xff]  ;;  %v398_v35 = vld [vmem:[%s1329_s3 + $0x20] sm:$0xff]  ;;  %v399_v36 = vld [vmem:[%s1329_s3 + $0x28] sm:$0xff] }
   0xb   :  { %v779_v34 = vpack.c.bf16 %v397_v33, %v396_v32  ;;  %v783_v37 = vpack.c.bf16 %v399_v36, %v398_v35  ;;  %v400_v38 = vld [vmem:[%s1329_s3 + $0x30] sm:$0xff]  ;;  %v401_v39 = vld [vmem:[%s1329_s3 + $0x38] sm:$0xff]  ;;  %v402_v41 = vld [vmem:[%s1329_s3 + $0x40] sm:$0xff]  ;;  %v52_v35 = vsub.s32 1, %v47_v54 }
   0xc   :  { %646 = vmatmul.mubr.msk.f32.vlgmr.msra.gmra.mrb[0].mxu0 %vm56_vm0, %v930_v13  ;;  %776 = vmatprep.subr.bf16.mxu1 %v775_v31  ;;  %v787_v40 = vpack.c.bf16 %v401_v39, %v400_v38  ;;  %v403_v42 = vld [vmem:[%s1329_s3 + $0x48] sm:$0xff]  ;;  %v404_v44 = vld [vmem:[%s1329_s3 + $0x50] sm:$0xff]  ;;  %v405_v45 = vld [vmem:[%s1329_s3 + $0x58] sm:$0xff] }
   0xd   :  { %175 = vmatprep.mubr.f32.mxu0 %v872_v3  ;;  %778 = vmatpush3.bf16.msra.mxu1 %v775_v31  ;;  %v791_v43 = vpack.c.bf16 %v403_v42, %v402_v41  ;;  %v795_v46 = vpack.c.bf16 %v405_v45, %v404_v44  ;;  %v406_v47 = vld [vmem:[%s1329_s3 + $0x60] sm:$0xff]  ;;  %v407_v48 = vld [vmem:[%s1329_s3 + $0x68] sm:$0xff]  ;;  %v408_v50 = vld [vmem:[%s1329_s3 + $0x70] sm:$0xff] }
   0xe   :  { %780 = vmatprep.subr.bf16.mxu1 %v779_v34  ;;  %v799_v49 = vpack.c.bf16 %v407_v48, %v406_v47  ;;  %v409_v51 = vld [vmem:[%s1329_s3 + $0x78] sm:$0xff]  ;;  %v44_v56 = vld [vmem:[%s1330_s2] sm:$0x3] }
   0xf   :  { %v803_v52 = vpack.c.bf16 %v409_v51, %v408_v50  ;;  %v1090_v57 = vrot.slane %v44_v56, %v48_v55  ;;  %v1118_v42 = vrot.slane %v44_v56, %v52_v35 }
  0x10   :  { %647 = vmatmul.mubr.msk.f32.gmra.mrb[2].mxu0 %vm56_vm0, %v937_v14 }
  0x11   :  { %181 = vmatprep.mubr.f32.mxu0 %v872_v3  ;;  %782 = vmatpush3.bf16.msra.mxu1 %v779_v34 }
  0x12   :  { %784 = vmatprep.subr.bf16.mxu1 %v783_v37 }
  0x14   :  { %648 = vmatmul.mubr.msk.f32.gmra.mrb[4].mxu0 %vm56_vm0, %v944_v15 }
  0x15   :  { %187 = vmatprep.mubr.f32.mxu0 %v872_v3  ;;  %786 = vmatpush3.bf16.msra.mxu1 %v783_v37 }
  0x16   :  { %788 = vmatprep.subr.bf16.mxu1 %v787_v40 }
  0x18   :  { %649 = vmatmul.mubr.msk.f32.gmra.mrb[6].mxu0 %vm56_vm0, %v951_v16 }
  0x19   :  { %193 = vmatprep.mubr.f32.mxu0 %v872_v3  ;;  %790 = vmatpush3.bf16.msra.mxu1 %v787_v40 }
  0x1a   :  { %792 = vmatprep.subr.bf16.mxu1 %v791_v43 }
  0x1c   :  { %650 = vmatmul.mubr.msk.f32.gmra.mrb[8].mxu0 %vm56_vm0, %v958_v17 }
  0x1d   :  { %199 = vmatprep.mubr.f32.mxu0 %v872_v3  ;;  %794 = vmatpush3.bf16.msra.mxu1 %v791_v43 }
  0x1e   :  { %796 = vmatprep.subr.bf16.mxu1 %v795_v46 }
  0x20   :  { %651 = vmatmul.mubr.msk.f32.gmra.mrb[10].mxu0 %vm56_vm0, %v965_v18 }
  0x21   :  { %205 = vmatprep.mubr.f32.mxu0 %v872_v3  ;;  %798 = vmatpush3.bf16.msra.mxu1 %v795_v46 }
  0x22   :  { %800 = vmatprep.subr.bf16.mxu1 %v799_v49 }
  0x24   :  { %652 = vmatmul.mubr.msk.f32.gmra.mrb[12].mxu0 %vm56_vm0, %v972_v19 }
  0x25   :  { %211 = vmatprep.mubr.f32.mxu0 %v872_v3  ;;  %802 = vmatpush3.bf16.msra.mxu1 %v799_v49 }
  0x26   :  { %804 = vmatprep.subr.bf16.mxu1 %v803_v52 }
  0x28   :  { %653 = vmatmul.mubr.msk.f32.gmra.mrb[14].mxu0 %vm56_vm0, %v979_v20 }
  0x29   :  { %217 = vmatprep.mubr.f32.mxu0 %v872_v3  ;;  %806 = vmatpush3.bf16.msra.mxu1 %v803_v52 }
  0x2c   :  { %654 = vmatmul.mubr.msk.f32.gmra.mrb[16].mxu0 %vm56_vm0, %v986_v21 }
  0x2d   :  { %223 = vmatprep.mubr.f32.mxu0 %v872_v3 }
  0x30   :  { %655 = vmatmul.mubr.msk.f32.gmra.mrb[18].mxu0 %vm56_vm0, %v993_v22 }
  0x31   :  { %229 = vmatprep.mubr.f32.mxu0 %v872_v3 }
  0x34   :  { %656 = vmatmul.mubr.msk.f32.gmra.mrb[20].mxu0 %vm56_vm0, %v1000_v23 }
  0x35   :  { %235 = vmatprep.mubr.f32.mxu0 %v872_v3 }
  0x38   :  { %657 = vmatmul.mubr.msk.f32.gmra.mrb[22].mxu0 %vm56_vm0, %v1007_v24 }
  0x39   :  { %241 = vmatprep.mubr.f32.mxu0 %v872_v3 }
  0x3c   :  { %658 = vmatmul.mubr.msk.f32.gmra.mrb[24].mxu0 %vm56_vm0, %v1014_v25 }
  0x3d   :  { %247 = vmatprep.mubr.f32.mxu0 %v872_v3 }
  0x40   :  { %659 = vmatmul.mubr.msk.f32.gmra.mrb[26].mxu0 %vm56_vm0, %v1021_v26 }
  0x41   :  { %253 = vmatprep.mubr.f32.mxu0 %v872_v3 }
  0x44   :  { %660 = vmatmul.mubr.msk.f32.gmra.mrb[28].mxu0 %vm56_vm0, %v1028_v27 }
  0x45   :  { %259 = vmatprep.mubr.f32.mxu0 %v872_v3 }
  0x48   :  { %661 = vmatmul.mubr.msk.f32.gmra.mrb[30].mxu0 %vm56_vm0, %v1035_v28 }
  0xdf   :  { %v171_v58 = vpop.f32.mrb[0].mxu0 }
  0xe0   :  { %v172_v59 = vadd.f32 %v171_v58, %v1090_v57  ;;  %v173_v60 = vpop.f32.mrb[1].mxu0 }
  0xe1   :  { %v174_v50 = vadd.f32 %v173_v60, %v1118_v42 }
  0xe2   :  { %v662_v61 = vmul.f32 -1.442695, %v172_v59 }
  0xe3   :  { %v177_v62 = vpop.f32.mrb[2].mxu0 }
  0xe4   :  { %808 = vpow2.f32 %v662_v61  ;;  %v178_v63 = vadd.f32 %v177_v62, %v1090_v57  ;;  %v179_v0 = vpop.f32.mrb[3].mxu0 }
  0xe6   :  { %v663_v1 = vmul.f32 -1.442695, %v178_v63 }
  0xe7   :  { %v183_v2 = vpop.f32.mrb[4].mxu0 }
  0xe8   :  { %810 = vpow2.f32 %v663_v1  ;;  %v1095_v3 = vadd.f32 %v183_v2, %v1090_v57  ;;  %v1097_v4 = vpop.f32.mrb[5].mxu0  ;;  %v180_v2 = vadd.f32 %v179_v0, %v1118_v42 }
  0xea   :  { %v664_v5 = vmul.f32 -1.442695, %v1095_v3 }
  0xeb   :  { %v189_v6 = vpop.f32.mrb[6].mxu0 }
  0xec   :  { %812 = vpow2.f32 %v664_v5  ;;  %v1101_v7 = vadd.f32 %v189_v6, %v1090_v57  ;;  %v1103_v8 = vpop.f32.mrb[7].mxu0 }
  0xee   :  { %v809_v9 = vpop.eup %808  ;;  %v665_v10 = vmul.f32 -1.442695, %v1101_v7 }
  0xef   :  { %v314_v11 = vadd.f32 1.0, %v809_v9  ;;  %v195_v12 = vpop.f32.mrb[8].mxu0 }
  0xf0   :  { %814 = vpow2.f32 %v665_v10  ;;  %v1107_v29 = vadd.f32 %v195_v12, %v1090_v57  ;;  %v1109_v30 = vpop.f32.mrb[9].mxu0 }
  0xf1   :  { %816 = vrcp.f32 %v314_v11 }
  0xf2   :  { %v811_v31 = vpop.eup %810  ;;  %v666_v32 = vmul.f32 -1.442695, %v1107_v29 }
  0xf3   :  { %v315_v33 = vadd.f32 1.0, %v811_v31  ;;  %v201_v34 = vpop.f32.mrb[10].mxu0 }
  0xf4   :  { %818 = vpow2.f32 %v666_v32  ;;  %v1113_v36 = vadd.f32 %v201_v34, %v1090_v57  ;;  %v1115_v37 = vpop.f32.mrb[11].mxu0 }
  0xf5   :  { %820 = vrcp.f32 %v315_v33 }
  0xf6   :  { %v813_v38 = vpop.eup %812  ;;  %v667_v39 = vmul.f32 -1.442695, %v1113_v36 }
  0xf7   :  { %v316_v40 = vadd.f32 1.0, %v813_v38  ;;  %v207_v41 = vpop.f32.mrb[12].mxu0 }
  0xf8   :  { %822 = vpow2.f32 %v667_v39  ;;  %v1121_v43 = vadd.f32 %v207_v41, %v1090_v57  ;;  %v1123_v44 = vpop.f32.mrb[13].mxu0 }
  0xf9   :  { %824 = vrcp.f32 %v316_v40 }
  0xfa   :  { %v815_v45 = vpop.eup %814  ;;  %v668_v46 = vmul.f32 -1.442695, %v1121_v43 }
  0xfb   :  { %v817_v47 = vpop.eup %816  ;;  %v317_v48 = vadd.f32 1.0, %v815_v45  ;;  %v213_v49 = vpop.f32.mrb[14].mxu0 }
  0xfc   :  { %826 = vpow2.f32 %v668_v46  ;;  %v1128_v51 = vadd.f32 %v213_v49, %v1090_v57  ;;  %v1130_v52 = vpop.f32.mrb[15].mxu0  ;;  %v362_v53 = vmul.f32 %v817_v47, %v172_v59 }
  0xfd   :  { %828 = vrcp.f32 %v317_v48 }
  0xfe   :  { %v819_v54 = vpop.eup %818  ;;  %v669_v55 = vmul.f32 -1.442695, %v1128_v51  ;;  %v378_v56 = vmul.f32 %v362_v53, %v174_v50 }
  0xff   :  { %v821_v58 = vpop.eup %820  ;;  %v318_v61 = vadd.f32 1.0, %v819_v54  ;;  %v219_v62 = vpop.f32.mrb[16].mxu0 }
 0x100   :  { %v363_v1 = vmul.f32 %v821_v58, %v178_v63  ;;  %830 = vpow2.f32 %v669_v55  ;;  %v1135_v60 = vadd.f32 %v219_v62, %v1090_v57  ;;  %v1137_v5 = vpop.f32.mrb[17].mxu0  ;;  %743 = vmatprep.mubr.f32.mxu1 %v378_v56  ;;  %v186_v63 = vadd.f32 %v1097_v4, %v1118_v42 }
 0x101   :  { %832 = vrcp.f32 %v318_v61  ;;  %v192_v4 = vadd.f32 %v1103_v8, %v1118_v42  ;;  %v198_v8 = vadd.f32 %v1109_v30, %v1118_v42  ;;  %v204_v30 = vadd.f32 %v1115_v37, %v1118_v42 }
 0x102   :  { %v823_v59 = vpop.eup %822  ;;  %v379_v6 = vmul.f32 %v363_v1, %v180_v2  ;;  %v670_v9 = vmul.f32 -1.442695, %v1135_v60  ;;  %v210_v37 = vadd.f32 %v1123_v44, %v1118_v42  ;;  %v216_v44 = vadd.f32 %v1130_v52, %v1118_v42 }
 0x103   :  { %v825_v10 = vpop.eup %824  ;;  %v319_v11 = vadd.f32 1.0, %v823_v59  ;;  %v225_v12 = vpop.f32.mrb[18].mxu0 }
 0x104   :  { %v364_v31 = vmul.f32 %v825_v10, %v1095_v3  ;;  %834 = vpow2.f32 %v670_v9  ;;  %v1144_v0 = vadd.f32 %v225_v12, %v1090_v57  ;;  %v1146_v32 = vpop.f32.mrb[19].mxu0  ;;  %744 = vmatmul.mubr.f32.vlgmr.msra.gmra.mrb[0].mxu1 %v379_v6 }
 0x105   :  { %836 = vrcp.f32 %v319_v11 }
 0x106   :  { %v827_v33 = vpop.eup %826  ;;  %v380_v34 = vmul.f32 %v364_v31, %v186_v63  ;;  %v671_v35 = vmul.f32 -1.442695, %v1144_v0 }
 0x107   :  { %v829_v38 = vpop.eup %828  ;;  %v320_v39 = vadd.f32 1.0, %v827_v33  ;;  %v231_v40 = vpop.f32.mrb[20].mxu0 }
 0x108   :  { %v365_v3 = vmul.f32 %v829_v38, %v1101_v7  ;;  %838 = vpow2.f32 %v671_v35  ;;  %v1153_v41 = vadd.f32 %v231_v40, %v1090_v57  ;;  %v1155_v45 = vpop.f32.mrb[21].mxu0  ;;  %746 = vmatprep.mubr.f32.mxu1 %v380_v34 }
 0x109   :  { %840 = vrcp.f32 %v320_v39 }
 0x10a   :  { %v831_v46 = vpop.eup %830  ;;  %v381_v47 = vmul.f32 %v365_v3, %v192_v4  ;;  %v672_v48 = vmul.f32 -1.442695, %v1153_v41 }
 0x10b   :  { %v833_v49 = vpop.eup %832  ;;  %v321_v50 = vadd.f32 1.0, %v831_v46  ;;  %v237_v53 = vpop.f32.mrb[22].mxu0 }
 0x10c   :  { %v366_v7 = vmul.f32 %v833_v49, %v1107_v29  ;;  %842 = vpow2.f32 %v672_v48  ;;  %v1162_v54 = vadd.f32 %v237_v53, %v1090_v57  ;;  %v1164_v55 = vpop.f32.mrb[23].mxu0  ;;  %747 = vmatmul.mubr.f32.gmra.mrb[2].mxu1 %v381_v47 }
 0x10d   :  { %844 = vrcp.f32 %v321_v50 }
 0x10e   :  { %v835_v56 = vpop.eup %834  ;;  %v382_v58 = vmul.f32 %v366_v7, %v198_v8  ;;  %v673_v61 = vmul.f32 -1.442695, %v1162_v54 }
 0x10f   :  { %v837_v62 = vpop.eup %836  ;;  %v322_v1 = vadd.f32 1.0, %v835_v56  ;;  %v243_v2 = vpop.f32.mrb[24].mxu0 }
 0x110   :  { %v367_v29 = vmul.f32 %v837_v62, %v1113_v36  ;;  %846 = vpow2.f32 %v673_v61  ;;  %v1171_v59 = vadd.f32 %v243_v2, %v1090_v57  ;;  %v1173_v6 = vpop.f32.mrb[25].mxu0  ;;  %749 = vmatprep.mubr.f32.mxu1 %v382_v58 }
 0x111   :  { %848 = vrcp.f32 %v322_v1 }
 0x112   :  { %v839_v9 = vpop.eup %838  ;;  %v383_v10 = vmul.f32 %v367_v29, %v204_v30  ;;  %v674_v11 = vmul.f32 -1.442695, %v1171_v59 }
 0x113   :  { %v841_v12 = vpop.eup %840  ;;  %v323_v31 = vadd.f32 1.0, %v839_v9  ;;  %v249_v63 = vpop.f32.mrb[26].mxu0  ;;  %v228_v9 = vadd.f32 %v1146_v32, %v1118_v42 }
 0x114   :  { %v368_v36 = vmul.f32 %v841_v12, %v1121_v43  ;;  %850 = vpow2.f32 %v674_v11  ;;  %v1180_v33 = vadd.f32 %v249_v63, %v1090_v57  ;;  %v1182_v34 = vpop.f32.mrb[27].mxu0  ;;  %750 = vmatmul.mubr.f32.gmra.mrb[4].mxu1 %v383_v10  ;;  %v234_v12 = vadd.f32 %v1155_v45, %v1118_v42 }
 0x115   :  { %852 = vrcp.f32 %v323_v31  ;;  %v246_v45 = vadd.f32 %v1173_v6, %v1118_v42 }
 0x116   :  { %v843_v35 = vpop.eup %842  ;;  %v384_v38 = vmul.f32 %v368_v36, %v210_v37  ;;  %v675_v39 = vmul.f32 -1.442695, %v1180_v33  ;;  %v240_v37 = vadd.f32 %v1164_v55, %v1118_v42  ;;  %v252_v55 = vadd.f32 %v1182_v34, %v1118_v42  ;;  %v1215_v34 = vld [vmem:[%s1331_s4] ss:$0 sm:$0xff] }
 0x117   :  { %v845_v40 = vpop.eup %844  ;;  %v324_v3 = vadd.f32 1.0, %v843_v35  ;;  %v255_v4 = vpop.f32.mrb[28].mxu0 }
 0x118   :  { %v369_v43 = vmul.f32 %v845_v40, %v1128_v51  ;;  %854 = vpow2.f32 %v675_v39  ;;  %v256_v46 = vadd.f32 %v255_v4, %v1090_v57  ;;  %v257_v47 = vpop.f32.mrb[29].mxu0  ;;  %752 = vmatprep.mubr.f32.mxu1 %v384_v38  ;;  %v222_v51 = vadd.f32 %v1137_v5, %v1118_v42 }
 0x119   :  { %856 = vrcp.f32 %v324_v3 }
 0x11a   :  { %v847_v48 = vpop.eup %846  ;;  %v385_v49 = vmul.f32 %v369_v43, %v216_v44  ;;  %v676_v50 = vmul.f32 -1.442695, %v256_v46 }
 0x11b   :  { %v849_v53 = vpop.eup %848  ;;  %v325_v7 = vadd.f32 1.0, %v847_v48  ;;  %v261_v8 = vpop.f32.mrb[30].mxu0 }
 0x11c   :  { %v370_v56 = vmul.f32 %v849_v53, %v1135_v60  ;;  %858 = vpow2.f32 %v676_v50  ;;  %v262_v52 = vadd.f32 %v261_v8, %v1090_v57  ;;  %v263_v58 = vpop.f32.mrb[31].mxu0  ;;  %753 = vmatmul.mubr.f32.gmra.mrb[6].mxu1 %v385_v49  ;;  %v258_v49 = vadd.f32 %v257_v47, %v1118_v42 }
 0x11d   :  { %860 = vrcp.f32 %v325_v7  ;;  %v264_v6 = vadd.f32 %v263_v58, %v1118_v42 }
 0x11e   :  { %v851_v61 = vpop.eup %850  ;;  %v386_v62 = vmul.f32 %v370_v56, %v222_v51  ;;  %v677_v1 = vmul.f32 -1.442695, %v262_v52 }
 0x11f   :  { %v853_v2 = vpop.eup %852  ;;  %v326_v29 = vadd.f32 1.0, %v851_v61 }
 0x120   :  { %v371_v30 = vmul.f32 %v853_v2, %v1144_v0  ;;  %862 = vpow2.f32 %v677_v1  ;;  %755 = vmatprep.mubr.f32.mxu1 %v386_v62 }
 0x121   :  { %864 = vrcp.f32 %v326_v29 }
 0x122   :  { %v855_v60 = vpop.eup %854  ;;  %v387_v5 = vmul.f32 %v371_v30, %v228_v9 }
 0x123   :  { %v857_v10 = vpop.eup %856  ;;  %v327_v57 = vadd.f32 1.0, %v855_v60 }
 0x124   :  { %v372_v11 = vmul.f32 %v857_v10, %v1153_v41  ;;  %756 = vmatmul.mubr.f32.gmra.mrb[8].mxu1 %v387_v5 }
 0x125   :  { %866 = vrcp.f32 %v327_v57 }
 0x126   :  { %v859_v31 = vpop.eup %858  ;;  %v388_v63 = vmul.f32 %v372_v11, %v234_v12 }
 0x127   :  { %v861_v0 = vpop.eup %860  ;;  %v328_v36 = vadd.f32 1.0, %v859_v31 }
 0x128   :  { %v373_v32 = vmul.f32 %v861_v0, %v1162_v54  ;;  %758 = vmatprep.mubr.f32.mxu1 %v388_v63 }
 0x129   :  { %868 = vrcp.f32 %v328_v36 }
 0x12a   :  { %v863_v35 = vpop.eup %862  ;;  %v389_v38 = vmul.f32 %v373_v32, %v240_v37 }
 0x12b   :  { %v865_v39 = vpop.eup %864  ;;  %v329_v41 = vadd.f32 1.0, %v863_v35 }
 0x12c   :  { %v374_v40 = vmul.f32 %v865_v39, %v1171_v59  ;;  %759 = vmatmul.mubr.f32.gmra.mrb[10].mxu1 %v389_v38 }
 0x12d   :  { %870 = vrcp.f32 %v329_v41 }
 0x12e   :  { %v390_v3 = vmul.f32 %v374_v40, %v246_v45 }
 0x12f   :  { %v867_v4 = vpop.eup %866 }
 0x130   :  { %v375_v54 = vmul.f32 %v867_v4, %v1180_v33  ;;  %761 = vmatprep.mubr.f32.mxu1 %v390_v3 }
 0x132   :  { %v391_v43 = vmul.f32 %v375_v54, %v252_v55 }
 0x133   :  { %v869_v44 = vpop.eup %868 }
 0x134   :  { %v376_v48 = vmul.f32 %v869_v44, %v256_v46  ;;  %762 = vmatmul.mubr.f32.gmra.mrb[12].mxu1 %v391_v43 }
 0x136   :  { %v392_v59 = vmul.f32 %v376_v48, %v258_v49 }
 0x137   :  { %v871_v50 = vpop.eup %870 }
 0x138   :  { %v377_v53 = vmul.f32 %v871_v50, %v262_v52  ;;  %764 = vmatprep.mubr.f32.mxu1 %v392_v59 }
 0x13a   :  { %v393_v7 = vmul.f32 %v377_v53, %v264_v6 }
 0x13c   :  { %765 = vmatmul.mubr.f32.gmra.mrb[14].mxu1 %v393_v7 }
 0x1d7   :  { %v745_v8 = vpop.f32.mrb[0].mxu1 }
 0x1d8   :  { %556 = vst.msk [vmem:[#allocation2 + $0x8] sm:$0xff] %vm56_vm0, %v745_v8  ;;  %v476_v33 = vpop.f32.mrb[1].mxu1 }
 0x1d9   :  { %555 = vst.msk [vmem:[#allocation2] sm:$0xff] %vm56_vm0, %v476_v33 }
 0x1df   :  { %v572_v46 = vld [vmem:[#allocation2 + $0x8] sm:$0xff]  ;;  %v748_v47 = vpop.f32.mrb[2].mxu1 }
 0x1e0   :  { %v595_v56 = vadd.f32 %v1215_v34, %v572_v46  ;;  %v571_v51 = vld [vmem:[#allocation2] sm:$0xff]  ;;  %558 = vst.msk [vmem:[#allocation2 + $0x18] sm:$0xff] %vm56_vm0, %v748_v47  ;;  %v486_v42 = vpop.f32.mrb[3].mxu1 }
 0x1e1   :  { %v594_v52 = vadd.f32 %v1215_v34, %v571_v51  ;;  %557 = vst.msk [vmem:[#allocation2 + $0x10] sm:$0xff] %vm56_vm0, %v486_v42 }
 0x1e2   :  { %v611_v58 = vadd.f32 %v595_v56, %v937_v14 }
 0x1e3   :  { %v610_v61 = vadd.f32 %v594_v52, %v930_v13 }
 0x1e4   :  { %627 = vst.msk [vmem:[%s1332_s5 + $0x8] sm:$0xff] %vm56_vm0, %v611_v58 }
 0x1e5   :  { %626 = vst.msk [vmem:[%s1332_s5] sm:$0xff] %vm56_vm0, %v610_v61 }
 0x1e7   :  { %v574_v62 = vld [vmem:[#allocation2 + $0x18] sm:$0xff]  ;;  %v751_v1 = vpop.f32.mrb[4].mxu1 }
 0x1e8   :  { %v597_v2 = vadd.f32 %v1215_v34, %v574_v62  ;;  %v573_v29 = vld [vmem:[#allocation2 + $0x10] sm:$0xff]  ;;  %560 = vst.msk [vmem:[#allocation2 + $0x28] sm:$0xff] %vm56_vm0, %v751_v1  ;;  %v496_v14 = vpop.f32.mrb[5].mxu1 }
 0x1e9   :  { %v596_v13 = vadd.f32 %v1215_v34, %v573_v29  ;;  %559 = vst.msk [vmem:[#allocation2 + $0x20] sm:$0xff] %vm56_vm0, %v496_v14 }
 0x1ea   :  { %v613_v30 = vadd.f32 %v597_v2, %v951_v16 }
 0x1eb   :  { %v612_v9 = vadd.f32 %v596_v13, %v944_v15 }
 0x1ec   :  { %629 = vst.msk [vmem:[%s1332_s5 + $0x18] sm:$0xff] %vm56_vm0, %v613_v30 }
 0x1ed   :  { %628 = vst.msk [vmem:[%s1332_s5 + $0x10] sm:$0xff] %vm56_vm0, %v612_v9 }
 0x1ef   :  { %v576_v60 = vld [vmem:[#allocation2 + $0x28] sm:$0xff]  ;;  %v754_v5 = vpop.f32.mrb[6].mxu1 }
 0x1f0   :  { %v599_v10 = vadd.f32 %v1215_v34, %v576_v60  ;;  %v575_v57 = vld [vmem:[#allocation2 + $0x20] sm:$0xff]  ;;  %562 = vst.msk [vmem:[#allocation2 + $0x38] sm:$0xff] %vm56_vm0, %v754_v5  ;;  %v506_v16 = vpop.f32.mrb[7].mxu1 }
 0x1f1   :  { %v598_v15 = vadd.f32 %v1215_v34, %v575_v57  ;;  %561 = vst.msk [vmem:[#allocation2 + $0x30] sm:$0xff] %vm56_vm0, %v506_v16 }
 0x1f2   :  { %v615_v11 = vadd.f32 %v599_v10, %v965_v18 }
 0x1f3   :  { %v614_v12 = vadd.f32 %v598_v15, %v958_v17 }
 0x1f4   :  { %631 = vst.msk [vmem:[%s1332_s5 + $0x28] sm:$0xff] %vm56_vm0, %v615_v11 }
 0x1f5   :  { %630 = vst.msk [vmem:[%s1332_s5 + $0x20] sm:$0xff] %vm56_vm0, %v614_v12 }
 0x1f7   :  { %v578_v31 = vld [vmem:[#allocation2 + $0x38] sm:$0xff]  ;;  %v757_v63 = vpop.f32.mrb[8].mxu1 }
 0x1f8   :  { %v601_v0 = vadd.f32 %v1215_v34, %v578_v31  ;;  %v577_v36 = vld [vmem:[#allocation2 + $0x30] sm:$0xff]  ;;  %564 = vst.msk [vmem:[#allocation2 + $0x48] sm:$0xff] %vm56_vm0, %v757_v63  ;;  %v516_v18 = vpop.f32.mrb[9].mxu1 }
 0x1f9   :  { %v600_v17 = vadd.f32 %v1215_v34, %v577_v36  ;;  %563 = vst.msk [vmem:[#allocation2 + $0x40] sm:$0xff] %vm56_vm0, %v516_v18 }
 0x1fa   :  { %v617_v32 = vadd.f32 %v601_v0, %v979_v20 }
 0x1fb   :  { %v616_v37 = vadd.f32 %v600_v17, %v972_v19 }
 0x1fc   :  { %633 = vst.msk [vmem:[%s1332_s5 + $0x38] sm:$0xff] %vm56_vm0, %v617_v32 }
 0x1fd   :  { %632 = vst.msk [vmem:[%s1332_s5 + $0x30] sm:$0xff] %vm56_vm0, %v616_v37 }
 0x1ff   :  { %v580_v35 = vld [vmem:[#allocation2 + $0x48] sm:$0xff]  ;;  %v760_v38 = vpop.f32.mrb[10].mxu1 }
 0x200   :  { %v603_v39 = vadd.f32 %v1215_v34, %v580_v35  ;;  %v579_v41 = vld [vmem:[#allocation2 + $0x40] sm:$0xff]  ;;  %566 = vst.msk [vmem:[#allocation2 + $0x58] sm:$0xff] %vm56_vm0, %v760_v38  ;;  %v526_v20 = vpop.f32.mrb[11].mxu1 }
 0x201   :  { %v602_v19 = vadd.f32 %v1215_v34, %v579_v41  ;;  %565 = vst.msk [vmem:[#allocation2 + $0x50] sm:$0xff] %vm56_vm0, %v526_v20 }
 0x202   :  { %v619_v40 = vadd.f32 %v603_v39, %v993_v22 }
 0x203   :  { %v618_v45 = vadd.f32 %v602_v19, %v986_v21 }
 0x204   :  { %635 = vst.msk [vmem:[%s1332_s5 + $0x48] sm:$0xff] %vm56_vm0, %v619_v40 }
 0x205   :  { %634 = vst.msk [vmem:[%s1332_s5 + $0x40] sm:$0xff] %vm56_vm0, %v618_v45 }
 0x207   :  { %v582_v3 = vld [vmem:[#allocation2 + $0x58] sm:$0xff]  ;;  %v763_v4 = vpop.f32.mrb[12].mxu1 }
 0x208   :  { %v605_v54 = vadd.f32 %v1215_v34, %v582_v3  ;;  %v581_v55 = vld [vmem:[#allocation2 + $0x50] sm:$0xff]  ;;  %568 = vst.msk [vmem:[#allocation2 + $0x68] sm:$0xff] %vm56_vm0, %v763_v4  ;;  %v536_v22 = vpop.f32.mrb[13].mxu1 }
 0x209   :  { %v604_v21 = vadd.f32 %v1215_v34, %v581_v55  ;;  %567 = vst.msk [vmem:[#allocation2 + $0x60] sm:$0xff] %vm56_vm0, %v536_v22 }
 0x20a   :  { %v621_v43 = vadd.f32 %v605_v54, %v1007_v24 }
 0x20b   :  { %v620_v44 = vadd.f32 %v604_v21, %v1000_v23 }
 0x20c   :  { %637 = vst.msk [vmem:[%s1332_s5 + $0x58] sm:$0xff] %vm56_vm0, %v621_v43 }
 0x20d   :  { %636 = vst.msk [vmem:[%s1332_s5 + $0x50] sm:$0xff] %vm56_vm0, %v620_v44 }
 0x20f   :  { %v584_v48 = vld [vmem:[#allocation2 + $0x68] sm:$0xff]  ;;  %v766_v49 = vpop.f32.mrb[14].mxu1 }
 0x210   :  { %v607_v59 = vadd.f32 %v1215_v34, %v584_v48  ;;  %v583_v50 = vld [vmem:[#allocation2 + $0x60] sm:$0xff]  ;;  %570 = vst.msk [vmem:[#allocation2 + $0x78] sm:$0xff] %vm56_vm0, %v766_v49  ;;  %v546_v24 = vpop.f32.mrb[15].mxu1 }
 0x211   :  { %v606_v23 = vadd.f32 %v1215_v34, %v583_v50  ;;  %569 = vst.msk [vmem:[#allocation2 + $0x70] sm:$0xff] %vm56_vm0, %v546_v24 }
 0x212   :  { %v623_v53 = vadd.f32 %v607_v59, %v1021_v26 }
 0x213   :  { %v622_v6 = vadd.f32 %v606_v23, %v1014_v25 }
 0x214   :  { %639 = vst.msk [vmem:[%s1332_s5 + $0x68] sm:$0xff] %vm56_vm0, %v623_v53 }
 0x215   :  { %638 = vst.msk [vmem:[%s1332_s5 + $0x60] sm:$0xff] %vm56_vm0, %v622_v6 }
 0x217   :  { %v586_v7 = vld [vmem:[#allocation2 + $0x78] sm:$0xff] }
 0x218   :  { %v609_v8 = vadd.f32 %v1215_v34, %v586_v7  ;;  %v585_v33 = vld [vmem:[#allocation2 + $0x70] sm:$0xff] }
 0x219   :  { %v608_v46 = vadd.f32 %v1215_v34, %v585_v33 }
 0x21a   :  { %v625_v26 = vadd.f32 %v609_v8, %v1035_v28 }
 0x21b   :  { %v624_v25 = vadd.f32 %v608_v46, %v1028_v27 }
 0x21c   :  { %641 = vst.msk [vmem:[%s1332_s5 + $0x78] sm:$0xff] %vm56_vm0, %v625_v26 }
 0x21d   :  { %640 = vst.msk [vmem:[%s1332_s5 + $0x70] sm:$0xff] %vm56_vm0, %v624_v25 }

// kernel: tpu_custom_call.1
= control target key start
LH: loop header
LB: loop body
LE: loop exit
PB: predicated region body
PF: predicated region fallthrough
CT: control target
= control target key end

     0   :  { %v872_v3 = vmov 0.0   ;;  %vm56_vm0 = vcmask 261120   ;;  %v46_v53 = vlaneseq  ;;  %s1327_s1 = inlined_call_operand.vmem [shape: f32[32,256], index: 1, kind: input, shape index: {}]   ;;  %s1328_s0 = inlined_call_operand.vmem [shape: f32[128,32], index: 0, kind: input, shape index: {}]   ;;  %s1329_s3 = inlined_call_operand.vmem [shape: f32[128,32], index: 3, kind: input, shape index: {}]   ;;  %s1330_s2 = inlined_call_operand.vmem [shape: f32[1,256], index: 2, kind: input, shape index: {}]   ;;  %s1331_s4 = inlined_call_operand.vmem [shape: f32[1,32], index: 4, kind: input, shape index: {}]   ;;  %s1332_s5 = inlined_call_operand.vmem [shape: f32[128,32], index: 5, kind: output, shape index: {}]  }
   0x1   :  { %v37_v0 = vld [vmem:[%s1327_s1 + $0x8] sm:$0xff]  ;;  %v39_v1 = vld [vmem:[%s1327_s1 + $0x18] sm:$0xff]  ;;  %v36_v2 = vld [vmem:[%s1327_s1] sm:$0xff]  ;;  %169 = vmatprep.mubr.f32.mxu0 %v872_v3 }
   0x2   :  { %v767_v4 = vpack.c.bf16 %v39_v1, %v37_v0  ;;  %v38_v5 = vld [vmem:[%s1327_s1 + $0x10] sm:$0xff]  ;;  %v41_v6 = vld [vmem:[%s1327_s1 + $0x28] sm:$0xff]  ;;  %v43_v7 = vld [vmem:[%s1327_s1 + $0x38] sm:$0xff]  ;;  %v47_v54 = vshrl.u32 %v46_v53, 7 }
   0x3   :  { %v769_v8 = vpack.c.bf16 %v38_v5, %v36_v2  ;;  %v771_v9 = vpack.c.bf16 %v43_v7, %v41_v6  ;;  %v40_v10 = vld [vmem:[%s1327_s1 + $0x20] sm:$0xff]  ;;  %v42_v11 = vld [vmem:[%s1327_s1 + $0x30] sm:$0xff]  ;;  %v937_v14 = vld [vmem:[%s1328_s0 + $0x8] sm:$0xff] }
   0x4   :  { %768 = vmatprep.subr.bf16.mxu0 %v767_v4  ;;  %v773_v12 = vpack.c.bf16 %v42_v11, %v40_v10  ;;  %v930_v13 = vld [vmem:[%s1328_s0] sm:$0xff]  ;;  %v944_v15 = vld [vmem:[%s1328_s0 + $0x10] sm:$0xff]  ;;  %v951_v16 = vld [vmem:[%s1328_s0 + $0x18] sm:$0xff]  ;;  %v48_v55 = vsub.s32 0, %v47_v54 }
   0x5   :  { %770 = vmatpush1.bf16.msra.mxu0 %v769_v8  ;;  %v958_v17 = vld [vmem:[%s1328_s0 + $0x20] sm:$0xff]  ;;  %v965_v18 = vld [vmem:[%s1328_s0 + $0x28] sm:$0xff]  ;;  %v972_v19 = vld [vmem:[%s1328_s0 + $0x30] sm:$0xff] }
   0x6   :  { %772 = vmatprep.subr.bf16.mxu0 %v771_v9  ;;  %v979_v20 = vld [vmem:[%s1328_s0 + $0x38] sm:$0xff]  ;;  %v986_v21 = vld [vmem:[%s1328_s0 + $0x40] sm:$0xff]  ;;  %v993_v22 = vld [vmem:[%s1328_s0 + $0x48] sm:$0xff] }
   0x7   :  { %v1000_v23 = vld [vmem:[%s1328_s0 + $0x50] sm:$0xff]  ;;  %v1007_v24 = vld [vmem:[%s1328_s0 + $0x58] sm:$0xff]  ;;  %v1014_v25 = vld [vmem:[%s1328_s0 + $0x60] sm:$0xff] }
   0x8   :  { %v1021_v26 = vld [vmem:[%s1328_s0 + $0x68] sm:$0xff]  ;;  %v1028_v27 = vld [vmem:[%s1328_s0 + $0x70] sm:$0xff]  ;;  %v1035_v28 = vld [vmem:[%s1328_s0 + $0x78] sm:$0xff] }
   0x9   :  { %774 = vmatpush1.bf16.msra.mxu0 %v773_v12  ;;  %v394_v29 = vld [vmem:[%s1329_s3] sm:$0xff]  ;;  %v395_v30 = vld [vmem:[%s1329_s3 + $0x8] sm:$0xff]  ;;  %v396_v32 = vld [vmem:[%s1329_s3 + $0x10] sm:$0xff] }
   0xa   :  { %v775_v31 = vpack.c.bf16 %v395_v30, %v394_v29  ;;  %v397_v33 = vld [vmem:[%s1329_s3 + $0x18] sm:$0xff]  ;;  %v398_v35 = vld [vmem:[%s1329_s3 + $0x20] sm:$0xff]  ;;  %v399_v36 = vld [vmem:[%s1329_s3 + $0x28] sm:$0xff] }
   0xb   :  { %v779_v34 = vpack.c.bf16 %v397_v33, %v396_v32  ;;  %v783_v37 = vpack.c.bf16 %v399_v36, %v398_v35  ;;  %v400_v38 = vld [vmem:[%s1329_s3 + $0x30] sm:$0xff]  ;;  %v401_v39 = vld [vmem:[%s1329_s3 + $0x38] sm:$0xff]  ;;  %v402_v41 = vld [vmem:[%s1329_s3 + $0x40] sm:$0xff]  ;;  %v52_v35 = vsub.s32 1, %v47_v54 }
   0xc   :  { %646 = vmatmul.mubr.msk.f32.vlgmr.msra.gmra.mrb[0].mxu0 %vm56_vm0, %v930_v13  ;;  %776 = vmatprep.subr.bf16.mxu1 %v775_v31  ;;  %v787_v40 = vpack.c.bf16 %v401_v39, %v400_v38  ;;  %v403_v42 = vld [vmem:[%s1329_s3 + $0x48] sm:$0xff]  ;;  %v404_v44 = vld [vmem:[%s1329_s3 + $0x50] sm:$0xff]  ;;  %v405_v45 = vld [vmem:[%s1329_s3 + $0x58] sm:$0xff] }
   0xd   :  { %175 = vmatprep.mubr.f32.mxu0 %v872_v3  ;;  %778 = vmatpush3.bf16.msra.mxu1 %v775_v31  ;;  %v791_v43 = vpack.c.bf16 %v403_v42, %v402_v41  ;;  %v795_v46 = vpack.c.bf16 %v405_v45, %v404_v44  ;;  %v406_v47 = vld [vmem:[%s1329_s3 + $0x60] sm:$0xff]  ;;  %v407_v48 = vld [vmem:[%s1329_s3 + $0x68] sm:$0xff]  ;;  %v408_v50 = vld [vmem:[%s1329_s3 + $0x70] sm:$0xff] }
   0xe   :  { %780 = vmatprep.subr.bf16.mxu1 %v779_v34  ;;  %v799_v49 = vpack.c.bf16 %v407_v48, %v406_v47  ;;  %v409_v51 = vld [vmem:[%s1329_s3 + $0x78] sm:$0xff]  ;;  %v44_v56 = vld [vmem:[%s1330_s2] sm:$0x3] }
   0xf   :  { %v803_v52 = vpack.c.bf16 %v409_v51, %v408_v50  ;;  %v1090_v57 = vrot.slane %v44_v56, %v48_v55  ;;  %v1118_v42 = vrot.slane %v44_v56, %v52_v35 }
  0x10   :  { %647 = vmatmul.mubr.msk.f32.gmra.mrb[2].mxu0 %vm56_vm0, %v937_v14 }
  0x11   :  { %181 = vmatprep.mubr.f32.mxu0 %v872_v3  ;;  %782 = vmatpush3.bf16.msra.mxu1 %v779_v34 }
  0x12   :  { %784 = vmatprep.subr.bf16.mxu1 %v783_v37 }
  0x14   :  { %648 = vmatmul.mubr.msk.f32.gmra.mrb[4].mxu0 %vm56_vm0, %v944_v15 }
  0x15   :  { %187 = vmatprep.mubr.f32.mxu0 %v872_v3  ;;  %786 = vmatpush3.bf16.msra.mxu1 %v783_v37 }
  0x16   :  { %788 = vmatprep.subr.bf16.mxu1 %v787_v40 }
  0x18   :  { %649 = vmatmul.mubr.msk.f32.gmra.mrb[6].mxu0 %vm56_vm0, %v951_v16 }
  0x19   :  { %193 = vmatprep.mubr.f32.mxu0 %v872_v3  ;;  %790 = vmatpush3.bf16.msra.mxu1 %v787_v40 }
  0x1a   :  { %792 = vmatprep.subr.bf16.mxu1 %v791_v43 }
  0x1c   :  { %650 = vmatmul.mubr.msk.f32.gmra.mrb[8].mxu0 %vm56_vm0, %v958_v17 }
  0x1d   :  { %199 = vmatprep.mubr.f32.mxu0 %v872_v3  ;;  %794 = vmatpush3.bf16.msra.mxu1 %v791_v43 }
  0x1e   :  { %796 = vmatprep.subr.bf16.mxu1 %v795_v46 }
  0x20   :  { %651 = vmatmul.mubr.msk.f32.gmra.mrb[10].mxu0 %vm56_vm0, %v965_v18 }
  0x21   :  { %205 = vmatprep.mubr.f32.mxu0 %v872_v3  ;;  %798 = vmatpush3.bf16.msra.mxu1 %v795_v46 }
  0x22   :  { %800 = vmatprep.subr.bf16.mxu1 %v799_v49 }
  0x24   :  { %652 = vmatmul.mubr.msk.f32.gmra.mrb[12].mxu0 %vm56_vm0, %v972_v19 }
  0x25   :  { %211 = vmatprep.mubr.f32.mxu0 %v872_v3  ;;  %802 = vmatpush3.bf16.msra.mxu1 %v799_v49 }
  0x26   :  { %804 = vmatprep.subr.bf16.mxu1 %v803_v52 }
  0x28   :  { %653 = vmatmul.mubr.msk.f32.gmra.mrb[14].mxu0 %vm56_vm0, %v979_v20 }
  0x29   :  { %217 = vmatprep.mubr.f32.mxu0 %v872_v3  ;;  %806 = vmatpush3.bf16.msra.mxu1 %v803_v52 }
  0x2c   :  { %654 = vmatmul.mubr.msk.f32.gmra.mrb[16].mxu0 %vm56_vm0, %v986_v21 }
  0x2d   :  { %223 = vmatprep.mubr.f32.mxu0 %v872_v3 }
  0x30   :  { %655 = vmatmul.mubr.msk.f32.gmra.mrb[18].mxu0 %vm56_vm0, %v993_v22 }
  0x31   :  { %229 = vmatprep.mubr.f32.mxu0 %v872_v3 }
  0x34   :  { %656 = vmatmul.mubr.msk.f32.gmra.mrb[20].mxu0 %vm56_vm0, %v1000_v23 }
  0x35   :  { %235 = vmatprep.mubr.f32.mxu0 %v872_v3 }
  0x38   :  { %657 = vmatmul.mubr.msk.f32.gmra.mrb[22].mxu0 %vm56_vm0, %v1007_v24 }
  0x39   :  { %241 = vmatprep.mubr.f32.mxu0 %v872_v3 }
  0x3c   :  { %658 = vmatmul.mubr.msk.f32.gmra.mrb[24].mxu0 %vm56_vm0, %v1014_v25 }
  0x3d   :  { %247 = vmatprep.mubr.f32.mxu0 %v872_v3 }
  0x40   :  { %659 = vmatmul.mubr.msk.f32.gmra.mrb[26].mxu0 %vm56_vm0, %v1021_v26 }
  0x41   :  { %253 = vmatprep.mubr.f32.mxu0 %v872_v3 }
  0x44   :  { %660 = vmatmul.mubr.msk.f32.gmra.mrb[28].mxu0 %vm56_vm0, %v1028_v27 }
  0x45   :  { %259 = vmatprep.mubr.f32.mxu0 %v872_v3 }
  0x48   :  { %661 = vmatmul.mubr.msk.f32.gmra.mrb[30].mxu0 %vm56_vm0, %v1035_v28 }
  0xdf   :  { %v171_v58 = vpop.f32.mrb[0].mxu0 }
  0xe0   :  { %v172_v59 = vadd.f32 %v171_v58, %v1090_v57  ;;  %v173_v60 = vpop.f32.mrb[1].mxu0 }
  0xe1   :  { %v174_v50 = vadd.f32 %v173_v60, %v1118_v42 }
  0xe2   :  { %v662_v61 = vmul.f32 -1.442695, %v172_v59 }
  0xe3   :  { %v177_v62 = vpop.f32.mrb[2].mxu0 }
  0xe4   :  { %808 = vpow2.f32 %v662_v61  ;;  %v178_v63 = vadd.f32 %v177_v62, %v1090_v57  ;;  %v179_v0 = vpop.f32.mrb[3].mxu0 }
  0xe6   :  { %v663_v1 = vmul.f32 -1.442695, %v178_v63 }
  0xe7   :  { %v183_v2 = vpop.f32.mrb[4].mxu0 }
  0xe8   :  { %810 = vpow2.f32 %v663_v1  ;;  %v1095_v3 = vadd.f32 %v183_v2, %v1090_v57  ;;  %v1097_v4 = vpop.f32.mrb[5].mxu0  ;;  %v180_v2 = vadd.f32 %v179_v0, %v1118_v42 }
  0xea   :  { %v664_v5 = vmul.f32 -1.442695, %v1095_v3 }
  0xeb   :  { %v189_v6 = vpop.f32.mrb[6].mxu0 }
  0xec   :  { %812 = vpow2.f32 %v664_v5  ;;  %v1101_v7 = vadd.f32 %v189_v6, %v1090_v57  ;;  %v1103_v8 = vpop.f32.mrb[7].mxu0 }
  0xee   :  { %v809_v9 = vpop.eup %808  ;;  %v665_v10 = vmul.f32 -1.442695, %v1101_v7 }
  0xef   :  { %v314_v11 = vadd.f32 1.0, %v809_v9  ;;  %v195_v12 = vpop.f32.mrb[8].mxu0 }
  0xf0   :  { %814 = vpow2.f32 %v665_v10  ;;  %v1107_v29 = vadd.f32 %v195_v12, %v1090_v57  ;;  %v1109_v30 = vpop.f32.mrb[9].mxu0 }
  0xf1   :  { %816 = vrcp.f32 %v314_v11 }
  0xf2   :  { %v811_v31 = vpop.eup %810  ;;  %v666_v32 = vmul.f32 -1.442695, %v1107_v29 }
  0xf3   :  { %v315_v33 = vadd.f32 1.0, %v811_v31  ;;  %v201_v34 = vpop.f32.mrb[10].mxu0 }
  0xf4   :  { %818 = vpow2.f32 %v666_v32  ;;  %v1113_v36 = vadd.f32 %v201_v34, %v1090_v57  ;;  %v1115_v37 = vpop.f32.mrb[11].mxu0 }
  0xf5   :  { %820 = vrcp.f32 %v315_v33 }
  0xf6   :  { %v813_v38 = vpop.eup %812  ;;  %v667_v39 = vmul.f32 -1.442695, %v1113_v36 }
  0xf7   :  { %v316_v40 = vadd.f32 1.0, %v813_v38  ;;  %v207_v41 = vpop.f32.mrb[12].mxu0 }
  0xf8   :  { %822 = vpow2.f32 %v667_v39  ;;  %v1121_v43 = vadd.f32 %v207_v41, %v1090_v57  ;;  %v1123_v44 = vpop.f32.mrb[13].mxu0 }
  0xf9   :  { %824 = vrcp.f32 %v316_v40 }
  0xfa   :  { %v815_v45 = vpop.eup %814  ;;  %v668_v46 = vmul.f32 -1.442695, %v1121_v43 }
  0xfb   :  { %v817_v47 = vpop.eup %816  ;;  %v317_v48 = vadd.f32 1.0, %v815_v45  ;;  %v213_v49 = vpop.f32.mrb[14].mxu0 }
  0xfc   :  { %826 = vpow2.f32 %v668_v46  ;;  %v1128_v51 = vadd.f32 %v213_v49, %v1090_v57  ;;  %v1130_v52 = vpop.f32.mrb[15].mxu0  ;;  %v362_v53 = vmul.f32 %v817_v47, %v172_v59 }
  0xfd   :  { %828 = vrcp.f32 %v317_v48 }
  0xfe   :  { %v819_v54 = vpop.eup %818  ;;  %v669_v55 = vmul.f32 -1.442695, %v1128_v51  ;;  %v378_v56 = vmul.f32 %v362_v53, %v174_v50 }
  0xff   :  { %v821_v58 = vpop.eup %820  ;;  %v318_v61 = vadd.f32 1.0, %v819_v54  ;;  %v219_v62 = vpop.f32.mrb[16].mxu0 }
 0x100   :  { %v363_v1 = vmul.f32 %v821_v58, %v178_v63  ;;  %830 = vpow2.f32 %v669_v55  ;;  %v1135_v60 = vadd.f32 %v219_v62, %v1090_v57  ;;  %v1137_v5 = vpop.f32.mrb[17].mxu0  ;;  %743 = vmatprep.mubr.f32.mxu1 %v378_v56  ;;  %v186_v63 = vadd.f32 %v1097_v4, %v1118_v42 }
 0x101   :  { %832 = vrcp.f32 %v318_v61  ;;  %v192_v4 = vadd.f32 %v1103_v8, %v1118_v42  ;;  %v198_v8 = vadd.f32 %v1109_v30, %v1118_v42  ;;  %v204_v30 = vadd.f32 %v1115_v37, %v1118_v42 }
 0x102   :  { %v823_v59 = vpop.eup %822  ;;  %v379_v6 = vmul.f32 %v363_v1, %v180_v2  ;;  %v670_v9 = vmul.f32 -1.442695, %v1135_v60  ;;  %v210_v37 = vadd.f32 %v1123_v44, %v1118_v42  ;;  %v216_v44 = vadd.f32 %v1130_v52, %v1118_v42 }
 0x103   :  { %v825_v10 = vpop.eup %824  ;;  %v319_v11 = vadd.f32 1.0, %v823_v59  ;;  %v225_v12 = vpop.f32.mrb[18].mxu0 }
 0x104   :  { %v364_v31 = vmul.f32 %v825_v10, %v1095_v3  ;;  %834 = vpow2.f32 %v670_v9  ;;  %v1144_v0 = vadd.f32 %v225_v12, %v1090_v57  ;;  %v1146_v32 = vpop.f32.mrb[19].mxu0  ;;  %744 = vmatmul.mubr.f32.vlgmr.msra.gmra.mrb[0].mxu1 %v379_v6 }
 0x105   :  { %836 = vrcp.f32 %v319_v11 }
 0x106   :  { %v827_v33 = vpop.eup %826  ;;  %v380_v34 = vmul.f32 %v364_v31, %v186_v63  ;;  %v671_v35 = vmul.f32 -1.442695, %v1144_v0 }
 0x107   :  { %v829_v38 = vpop.eup %828  ;;  %v320_v39 = vadd.f32 1.0, %v827_v33  ;;  %v231_v40 = vpop.f32.mrb[20].mxu0 }
 0x108   :  { %v365_v3 = vmul.f32 %v829_v38, %v1101_v7  ;;  %838 = vpow2.f32 %v671_v35  ;;  %v1153_v41 = vadd.f32 %v231_v40, %v1090_v57  ;;  %v1155_v45 = vpop.f32.mrb[21].mxu0  ;;  %746 = vmatprep.mubr.f32.mxu1 %v380_v34 }
 0x109   :  { %840 = vrcp.f32 %v320_v39 }
 0x10a   :  { %v831_v46 = vpop.eup %830  ;;  %v381_v47 = vmul.f32 %v365_v3, %v192_v4  ;;  %v672_v48 = vmul.f32 -1.442695, %v1153_v41 }
 0x10b   :  { %v833_v49 = vpop.eup %832  ;;  %v321_v50 = vadd.f32 1.0, %v831_v46  ;;  %v237_v53 = vpop.f32.mrb[22].mxu0 }
 0x10c   :  { %v366_v7 = vmul.f32 %v833_v49, %v1107_v29  ;;  %842 = vpow2.f32 %v672_v48  ;;  %v1162_v54 = vadd.f32 %v237_v53, %v1090_v57  ;;  %v1164_v55 = vpop.f32.mrb[23].mxu0  ;;  %747 = vmatmul.mubr.f32.gmra.mrb[2].mxu1 %v381_v47 }
 0x10d   :  { %844 = vrcp.f32 %v321_v50 }
 0x10e   :  { %v835_v56 = vpop.eup %834  ;;  %v382_v58 = vmul.f32 %v366_v7, %v198_v8  ;;  %v673_v61 = vmul.f32 -1.442695, %v1162_v54 }
 0x10f   :  { %v837_v62 = vpop.eup %836  ;;  %v322_v1 = vadd.f32 1.0, %v835_v56  ;;  %v243_v2 = vpop.f32.mrb[24].mxu0 }
 0x110   :  { %v367_v29 = vmul.f32 %v837_v62, %v1113_v36  ;;  %846 = vpow2.f32 %v673_v61  ;;  %v1171_v59 = vadd.f32 %v243_v2, %v1090_v57  ;;  %v1173_v6 = vpop.f32.mrb[25].mxu0  ;;  %749 = vmatprep.mubr.f32.mxu1 %v382_v58 }
 0x111   :  { %848 = vrcp.f32 %v322_v1 }
 0x112   :  { %v839_v9 = vpop.eup %838  ;;  %v383_v10 = vmul.f32 %v367_v29, %v204_v30  ;;  %v674_v11 = vmul.f32 -1.442695, %v1171_v59 }
 0x113   :  { %v841_v12 = vpop.eup %840  ;;  %v323_v31 = vadd.f32 1.0, %v839_v9  ;;  %v249_v63 = vpop.f32.mrb[26].mxu0  ;;  %v228_v9 = vadd.f32 %v1146_v32, %v1118_v42 }
 0x114   :  { %v368_v36 = vmul.f32 %v841_v12, %v1121_v43  ;;  %850 = vpow2.f32 %v674_v11  ;;  %v1180_v33 = vadd.f32 %v249_v63, %v1090_v57  ;;  %v1182_v34 = vpop.f32.mrb[27].mxu0  ;;  %750 = vmatmul.mubr.f32.gmra.mrb[4].mxu1 %v383_v10  ;;  %v234_v12 = vadd.f32 %v1155_v45, %v1118_v42 }
 0x115   :  { %852 = vrcp.f32 %v323_v31  ;;  %v246_v45 = vadd.f32 %v1173_v6, %v1118_v42 }
 0x116   :  { %v843_v35 = vpop.eup %842  ;;  %v384_v38 = vmul.f32 %v368_v36, %v210_v37  ;;  %v675_v39 = vmul.f32 -1.442695, %v1180_v33  ;;  %v240_v37 = vadd.f32 %v1164_v55, %v1118_v42  ;;  %v252_v55 = vadd.f32 %v1182_v34, %v1118_v42  ;;  %v1215_v34 = vld [vmem:[%s1331_s4] ss:$0 sm:$0xff] }
 0x117   :  { %v845_v40 = vpop.eup %844  ;;  %v324_v3 = vadd.f32 1.0, %v843_v35  ;;  %v255_v4 = vpop.f32.mrb[28].mxu0 }
 0x118   :  { %v369_v43 = vmul.f32 %v845_v40, %v1128_v51  ;;  %854 = vpow2.f32 %v675_v39  ;;  %v256_v46 = vadd.f32 %v255_v4, %v1090_v57  ;;  %v257_v47 = vpop.f32.mrb[29].mxu0  ;;  %752 = vmatprep.mubr.f32.mxu1 %v384_v38  ;;  %v222_v51 = vadd.f32 %v1137_v5, %v1118_v42 }
 0x119   :  { %856 = vrcp.f32 %v324_v3 }
 0x11a   :  { %v847_v48 = vpop.eup %846  ;;  %v385_v49 = vmul.f32 %v369_v43, %v216_v44  ;;  %v676_v50 = vmul.f32 -1.442695, %v256_v46 }
 0x11b   :  { %v849_v53 = vpop.eup %848  ;;  %v325_v7 = vadd.f32 1.0, %v847_v48  ;;  %v261_v8 = vpop.f32.mrb[30].mxu0 }
 0x11c   :  { %v370_v56 = vmul.f32 %v849_v53, %v1135_v60  ;;  %858 = vpow2.f32 %v676_v50  ;;  %v262_v52 = vadd.f32 %v261_v8, %v1090_v57  ;;  %v263_v58 = vpop.f32.mrb[31].mxu0  ;;  %753 = vmatmul.mubr.f32.gmra.mrb[6].mxu1 %v385_v49  ;;  %v258_v49 = vadd.f32 %v257_v47, %v1118_v42 }
 0x11d   :  { %860 = vrcp.f32 %v325_v7  ;;  %v264_v6 = vadd.f32 %v263_v58, %v1118_v42 }
 0x11e   :  { %v851_v61 = vpop.eup %850  ;;  %v386_v62 = vmul.f32 %v370_v56, %v222_v51  ;;  %v677_v1 = vmul.f32 -1.442695, %v262_v52 }
 0x11f   :  { %v853_v2 = vpop.eup %852  ;;  %v326_v29 = vadd.f32 1.0, %v851_v61 }
 0x120   :  { %v371_v30 = vmul.f32 %v853_v2, %v1144_v0  ;;  %862 = vpow2.f32 %v677_v1  ;;  %755 = vmatprep.mubr.f32.mxu1 %v386_v62 }
 0x121   :  { %864 = vrcp.f32 %v326_v29 }
 0x122   :  { %v855_v60 = vpop.eup %854  ;;  %v387_v5 = vmul.f32 %v371_v30, %v228_v9 }
 0x123   :  { %v857_v10 = vpop.eup %856  ;;  %v327_v57 = vadd.f32 1.0, %v855_v60 }
 0x124   :  { %v372_v11 = vmul.f32 %v857_v10, %v1153_v41  ;;  %756 = vmatmul.mubr.f32.gmra.mrb[8].mxu1 %v387_v5 }
 0x125   :  { %866 = vrcp.f32 %v327_v57 }
 0x126   :  { %v859_v31 = vpop.eup %858  ;;  %v388_v63 = vmul.f32 %v372_v11, %v234_v12 }
 0x127   :  { %v861_v0 = vpop.eup %860  ;;  %v328_v36 = vadd.f32 1.0, %v859_v31 }
 0x128   :  { %v373_v32 = vmul.f32 %v861_v0, %v1162_v54  ;;  %758 = vmatprep.mubr.f32.mxu1 %v388_v63 }
 0x129   :  { %868 = vrcp.f32 %v328_v36 }
 0x12a   :  { %v863_v35 = vpop.eup %862  ;;  %v389_v38 = vmul.f32 %v373_v32, %v240_v37 }
 0x12b   :  { %v865_v39 = vpop.eup %864  ;;  %v329_v41 = vadd.f32 1.0, %v863_v35 }
 0x12c   :  { %v374_v40 = vmul.f32 %v865_v39, %v1171_v59  ;;  %759 = vmatmul.mubr.f32.gmra.mrb[10].mxu1 %v389_v38 }
 0x12d   :  { %870 = vrcp.f32 %v329_v41 }
 0x12e   :  { %v390_v3 = vmul.f32 %v374_v40, %v246_v45 }
 0x12f   :  { %v867_v4 = vpop.eup %866 }
 0x130   :  { %v375_v54 = vmul.f32 %v867_v4, %v1180_v33  ;;  %761 = vmatprep.mubr.f32.mxu1 %v390_v3 }
 0x132   :  { %v391_v43 = vmul.f32 %v375_v54, %v252_v55 }
 0x133   :  { %v869_v44 = vpop.eup %868 }
 0x134   :  { %v376_v48 = vmul.f32 %v869_v44, %v256_v46  ;;  %762 = vmatmul.mubr.f32.gmra.mrb[12].mxu1 %v391_v43 }
 0x136   :  { %v392_v59 = vmul.f32 %v376_v48, %v258_v49 }
 0x137   :  { %v871_v50 = vpop.eup %870 }
 0x138   :  { %v377_v53 = vmul.f32 %v871_v50, %v262_v52  ;;  %764 = vmatprep.mubr.f32.mxu1 %v392_v59 }
 0x13a   :  { %v393_v7 = vmul.f32 %v377_v53, %v264_v6 }
 0x13c   :  { %765 = vmatmul.mubr.f32.gmra.mrb[14].mxu1 %v393_v7 }
 0x1d7   :  { %v745_v8 = vpop.f32.mrb[0].mxu1 }
 0x1d8   :  { %556 = vst.msk [vmem:[#allocation2 + $0x8] sm:$0xff] %vm56_vm0, %v745_v8  ;;  %v476_v33 = vpop.f32.mrb[1].mxu1 }
 0x1d9   :  { %555 = vst.msk [vmem:[#allocation2] sm:$0xff] %vm56_vm0, %v476_v33 }
 0x1df   :  { %v572_v46 = vld [vmem:[#allocation2 + $0x8] sm:$0xff]  ;;  %v748_v47 = vpop.f32.mrb[2].mxu1 }
 0x1e0   :  { %v595_v56 = vadd.f32 %v1215_v34, %v572_v46  ;;  %v571_v51 = vld [vmem:[#allocation2] sm:$0xff]  ;;  %558 = vst.msk [vmem:[#allocation2 + $0x18] sm:$0xff] %vm56_vm0, %v748_v47  ;;  %v486_v42 = vpop.f32.mrb[3].mxu1 }
 0x1e1   :  { %v594_v52 = vadd.f32 %v1215_v34, %v571_v51  ;;  %557 = vst.msk [vmem:[#allocation2 + $0x10] sm:$0xff] %vm56_vm0, %v486_v42 }
 0x1e2   :  { %v611_v58 = vadd.f32 %v595_v56, %v937_v14 }
 0x1e3   :  { %v610_v61 = vadd.f32 %v594_v52, %v930_v13 }
 0x1e4   :  { %627 = vst.msk [vmem:[%s1332_s5 + $0x8] sm:$0xff] %vm56_vm0, %v611_v58 }
 0x1e5   :  { %626 = vst.msk [vmem:[%s1332_s5] sm:$0xff] %vm56_vm0, %v610_v61 }
 0x1e7   :  { %v574_v62 = vld [vmem:[#allocation2 + $0x18] sm:$0xff]  ;;  %v751_v1 = vpop.f32.mrb[4].mxu1 }
 0x1e8   :  { %v597_v2 = vadd.f32 %v1215_v34, %v574_v62  ;;  %v573_v29 = vld [vmem:[#allocation2 + $0x10] sm:$0xff]  ;;  %560 = vst.msk [vmem:[#allocation2 + $0x28] sm:$0xff] %vm56_vm0, %v751_v1  ;;  %v496_v14 = vpop.f32.mrb[5].mxu1 }
 0x1e9   :  { %v596_v13 = vadd.f32 %v1215_v34, %v573_v29  ;;  %559 = vst.msk [vmem:[#allocation2 + $0x20] sm:$0xff] %vm56_vm0, %v496_v14 }
 0x1ea   :  { %v613_v30 = vadd.f32 %v597_v2, %v951_v16 }
 0x1eb   :  { %v612_v9 = vadd.f32 %v596_v13, %v944_v15 }
 0x1ec   :  { %629 = vst.msk [vmem:[%s1332_s5 + $0x18] sm:$0xff] %vm56_vm0, %v613_v30 }
 0x1ed   :  { %628 = vst.msk [vmem:[%s1332_s5 + $0x10] sm:$0xff] %vm56_vm0, %v612_v9 }
 0x1ef   :  { %v576_v60 = vld [vmem:[#allocation2 + $0x28] sm:$0xff]  ;;  %v754_v5 = vpop.f32.mrb[6].mxu1 }
 0x1f0   :  { %v599_v10 = vadd.f32 %v1215_v34, %v576_v60  ;;  %v575_v57 = vld [vmem:[#allocation2 + $0x20] sm:$0xff]  ;;  %562 = vst.msk [vmem:[#allocation2 + $0x38] sm:$0xff] %vm56_vm0, %v754_v5  ;;  %v506_v16 = vpop.f32.mrb[7].mxu1 }
 0x1f1   :  { %v598_v15 = vadd.f32 %v1215_v34, %v575_v57  ;;  %561 = vst.msk [vmem:[#allocation2 + $0x30] sm:$0xff] %vm56_vm0, %v506_v16 }
 0x1f2   :  { %v615_v11 = vadd.f32 %v599_v10, %v965_v18 }
 0x1f3   :  { %v614_v12 = vadd.f32 %v598_v15, %v958_v17 }
 0x1f4   :  { %631 = vst.msk [vmem:[%s1332_s5 + $0x28] sm:$0xff] %vm56_vm0, %v615_v11 }
 0x1f5   :  { %630 = vst.msk [vmem:[%s1332_s5 + $0x20] sm:$0xff] %vm56_vm0, %v614_v12 }
 0x1f7   :  { %v578_v31 = vld [vmem:[#allocation2 + $0x38] sm:$0xff]  ;;  %v757_v63 = vpop.f32.mrb[8].mxu1 }
 0x1f8   :  { %v601_v0 = vadd.f32 %v1215_v34, %v578_v31  ;;  %v577_v36 = vld [vmem:[#allocation2 + $0x30] sm:$0xff]  ;;  %564 = vst.msk [vmem:[#allocation2 + $0x48] sm:$0xff] %vm56_vm0, %v757_v63  ;;  %v516_v18 = vpop.f32.mrb[9].mxu1 }
 0x1f9   :  { %v600_v17 = vadd.f32 %v1215_v34, %v577_v36  ;;  %563 = vst.msk [vmem:[#allocation2 + $0x40] sm:$0xff] %vm56_vm0, %v516_v18 }
 0x1fa   :  { %v617_v32 = vadd.f32 %v601_v0, %v979_v20 }
 0x1fb   :  { %v616_v37 = vadd.f32 %v600_v17, %v972_v19 }
 0x1fc   :  { %633 = vst.msk [vmem:[%s1332_s5 + $0x38] sm:$0xff] %vm56_vm0, %v617_v32 }
 0x1fd   :  { %632 = vst.msk [vmem:[%s1332_s5 + $0x30] sm:$0xff] %vm56_vm0, %v616_v37 }
 0x1ff   :  { %v580_v35 = vld [vmem:[#allocation2 + $0x48] sm:$0xff]  ;;  %v760_v38 = vpop.f32.mrb[10].mxu1 }
 0x200   :  { %v603_v39 = vadd.f32 %v1215_v34, %v580_v35  ;;  %v579_v41 = vld [vmem:[#allocation2 + $0x40] sm:$0xff]  ;;  %566 = vst.msk [vmem:[#allocation2 + $0x58] sm:$0xff] %vm56_vm0, %v760_v38  ;;  %v526_v20 = vpop.f32.mrb[11].mxu1 }
 0x201   :  { %v602_v19 = vadd.f32 %v1215_v34, %v579_v41  ;;  %565 = vst.msk [vmem:[#allocation2 + $0x50] sm:$0xff] %vm56_vm0, %v526_v20 }
 0x202   :  { %v619_v40 = vadd.f32 %v603_v39, %v993_v22 }
 0x203   :  { %v618_v45 = vadd.f32 %v602_v19, %v986_v21 }
 0x204   :  { %635 = vst.msk [vmem:[%s1332_s5 + $0x48] sm:$0xff] %vm56_vm0, %v619_v40 }
 0x205   :  { %634 = vst.msk [vmem:[%s1332_s5 + $0x40] sm:$0xff] %vm56_vm0, %v618_v45 }
 0x207   :  { %v582_v3 = vld [vmem:[#allocation2 + $0x58] sm:$0xff]  ;;  %v763_v4 = vpop.f32.mrb[12].mxu1 }
 0x208   :  { %v605_v54 = vadd.f32 %v1215_v34, %v582_v3  ;;  %v581_v55 = vld [vmem:[#allocation2 + $0x50] sm:$0xff]  ;;  %568 = vst.msk [vmem:[#allocation2 + $0x68] sm:$0xff] %vm56_vm0, %v763_v4  ;;  %v536_v22 = vpop.f32.mrb[13].mxu1 }
 0x209   :  { %v604_v21 = vadd.f32 %v1215_v34, %v581_v55  ;;  %567 = vst.msk [vmem:[#allocation2 + $0x60] sm:$0xff] %vm56_vm0, %v536_v22 }
 0x20a   :  { %v621_v43 = vadd.f32 %v605_v54, %v1007_v24 }
 0x20b   :  { %v620_v44 = vadd.f32 %v604_v21, %v1000_v23 }
 0x20c   :  { %637 = vst.msk [vmem:[%s1332_s5 + $0x58] sm:$0xff] %vm56_vm0, %v621_v43 }
 0x20d   :  { %636 = vst.msk [vmem:[%s1332_s5 + $0x50] sm:$0xff] %vm56_vm0, %v620_v44 }
 0x20f   :  { %v584_v48 = vld [vmem:[#allocation2 + $0x68] sm:$0xff]  ;;  %v766_v49 = vpop.f32.mrb[14].mxu1 }
 0x210   :  { %v607_v59 = vadd.f32 %v1215_v34, %v584_v48  ;;  %v583_v50 = vld [vmem:[#allocation2 + $0x60] sm:$0xff]  ;;  %570 = vst.msk [vmem:[#allocation2 + $0x78] sm:$0xff] %vm56_vm0, %v766_v49  ;;  %v546_v24 = vpop.f32.mrb[15].mxu1 }
 0x211   :  { %v606_v23 = vadd.f32 %v1215_v34, %v583_v50  ;;  %569 = vst.msk [vmem:[#allocation2 + $0x70] sm:$0xff] %vm56_vm0, %v546_v24 }
 0x212   :  { %v623_v53 = vadd.f32 %v607_v59, %v1021_v26 }
 0x213   :  { %v622_v6 = vadd.f32 %v606_v23, %v1014_v25 }
 0x214   :  { %639 = vst.msk [vmem:[%s1332_s5 + $0x68] sm:$0xff] %vm56_vm0, %v623_v53 }
 0x215   :  { %638 = vst.msk [vmem:[%s1332_s5 + $0x60] sm:$0xff] %vm56_vm0, %v622_v6 }
 0x217   :  { %v586_v7 = vld [vmem:[#allocation2 + $0x78] sm:$0xff] }
 0x218   :  { %v609_v8 = vadd.f32 %v1215_v34, %v586_v7  ;;  %v585_v33 = vld [vmem:[#allocation2 + $0x70] sm:$0xff] }
 0x219   :  { %v608_v46 = vadd.f32 %v1215_v34, %v585_v33 }
 0x21a   :  { %v625_v26 = vadd.f32 %v609_v8, %v1035_v28 }
 0x21b   :  { %v624_v25 = vadd.f32 %v608_v46, %v1028_v27 }
 0x21c   :  { %641 = vst.msk [vmem:[%s1332_s5 + $0x78] sm:$0xff] %vm56_vm0, %v625_v26 }
 0x21d   :  { %640 = vst.msk [vmem:[%s1332_s5 + $0x70] sm:$0xff] %vm56_vm0, %v624_v25 }

</bundles_post_ra>
